<compile_context>
chip_gen: v7x
topology: tpu7x:2x2x1
jax: 0.10.0
libtpu: 0.0.40
codegen_flags: <defaults>
</compile_context>

<pallas_src>
import functools
import math

import jax
import jax.numpy as jnp
from jax import lax
from jax.experimental import pallas as pl
from jax.experimental.pallas import tpu as pltpu


def _round_up(x, m):
    return ((x + m - 1) // m) * m


def _sublane_tile(dtype):
    # 8 rows for 4-byte dtypes, 16 for 2-byte, 32 for 1-byte.
    return max(8, 32 // max(1, jnp.dtype(dtype).itemsize))


def _maybe_pad_dim(n, tile, max_inflation=1.25):
    """Pad n to a multiple of `tile` only if the inflation stays small.

    For tiny dims (e.g. Lk=6 -> 128 would be 21x) keep the natural size: the
    block then equals the full array dim (legal) and Mosaic masks in-register,
    instead of streaming / storing mostly-zero tiles through HBM."""
    padded = _round_up(n, tile)
    return padded if padded <= int(max_inflation * n) else n


def _tpu_info():
    """(vmem_bytes_per_core, num_tensorcores) with conservative fallbacks."""
    vmem_bytes = 64 * 1024 * 1024          # smallest across v5e/v6e/v7x
    num_cores = 1
    try:
        info = pltpu.get_tpu_info()
        for name in ("vmem_capacity_bytes", "vmem_bytes", "vmem_size_bytes"):
            val = getattr(info, name, None)
            if val:
                vmem_bytes = int(val)
                break
        for name in ("num_cores", "cores_per_chip", "num_tensorcores",
                     "tensorcore_count"):
            val = getattr(info, name, None)
            if val:
                num_cores = int(val)
                break
    except Exception:
        pass
    return vmem_bytes, num_cores


def _block_vmem_bytes(bb, lq, lk, d, in_bytes, mxu_bytes):
    # Double-buffered IO blocks + (conservatively double-buffered) weights +
    # f32/bf16 intermediates.
    io = 2 * bb * (2 * lq * d + lk * d + lq * lk) * in_bytes      # o, y, c, attn
    weights = 2 * (2 * d * d * mxu_bytes + d * 4)                 # [W1;W2], bias
    tmp = bb * (3 * lq * lk + 2 * lq * d) * 4 + bb * lq * 3 * d * mxu_bytes
    return io + weights + tmp


def _choose_batch_block(batch, lq, lk, d, in_bytes, mxu_bytes, vmem_budget,
                        num_cores):
    # Aim for >=256 rows in the fused (Bb*Lq, 2D) @ (2D, D) Linear matmul
    # (MXU M-utilization), capped by the batch and the VMEM budget.
    bb = max(1, min(batch, max(1, 256 // max(lq, 1))))
    while bb > 1 and _block_vmem_bytes(bb, lq, lk, d, in_bytes,
                                       mxu_bytes) > vmem_budget:
        bb //= 2
    if num_cores > 1 and batch >= 2 * num_cores:
        # Keep >=2 grid steps per TensorCore (v7x) so block DMAs pipeline
        # behind compute; single-core chips keep the largest block instead.
        bb = min(bb, max(1, batch // (2 * num_cores)))
    return max(1, bb)


def _attention_kernel(*refs, n_valid_keys, mxu_dtype, fused_linear):
    # Block shapes:
    #   out_ref  : (Bb, Lq, D)    decoder output block
    #   ctx_ref  : (Bb, Lk, D)    encoder context block
    #   w refs   : (2D, D) fused, or two (D, D)  (== W[:, :D].T and W[:, D:].T)
    #   b_ref    : (1, D)  f32
    #   y_ref    : (Bb, Lq, D)
    #   attn_ref : (Bb, Lq, Lk)
    if fused_linear:
        out_ref, ctx_ref, w_ref, b_ref, y_ref, attn_ref = refs
    else:
        out_ref, ctx_ref, w1_ref, w2_ref, b_ref, y_ref, attn_ref = refs

    bb, lq, d = y_ref.shape
    lk = attn_ref.shape[-1]

    # MXU operands in mxu_dtype (bf16 for f32 inputs); accumulate in f32.
    o = out_ref[...].astype(mxu_dtype)
    c = ctx_ref[...].astype(mxu_dtype)

    # scores[b] = output[b] @ context[b].T  (contract last dims, no transpose).
    scores = lax.dot_general(
        o, c, dimension_numbers=(((2,), (2,)), ((0,), (0,))),
        preferred_element_type=jnp.float32)            # (Bb, Lq, Lk) f32

    if n_valid_keys is not None and n_valid_keys < lk:
        # Mask zero-padded keys so they get zero attention weight (f32 mask).
        key_ids = lax.broadcasted_iota(jnp.int32, scores.shape, 2)
        scores = jnp.where(key_ids < n_valid_keys, scores, -1e30)

    # Row softmax in f32 with exact normalization
    # (== F.softmax(attn.view(-1, input_len))).
    m = jnp.max(scores, axis=-1, keepdims=True)
    e = jnp.exp(scores - m)
    attn = e / jnp.sum(e, axis=-1, keepdims=True)
    attn_ref[...] = attn.astype(attn_ref.dtype)

    # mix[b] = attn[b] @ context[b]
    mix = lax.dot_general(
        attn.astype(mxu_dtype), c,
        dimension_numbers=(((2,), (1,)), ((0,), (0,))),
        preferred_element_type=jnp.float32)            # (Bb, Lq, D) f32

    # Final Linear fused across the whole batch block:
    #   tanh(cat(mix, o) @ W.T + b)
    if fused_linear:
        # One (Bb*Lq, 2D) @ (2D, D) matmul (K = 2D fills the deep MXU).
        cat = jnp.concatenate([mix.astype(mxu_dtype), o], axis=-1)
        pre = jnp.dot(cat.reshape(bb * lq, 2 * d), w_ref[...],
                      preferred_element_type=jnp.float32)
    else:
        # Two (Bb*Lq, D) @ (D, D) matmuls summed (safe for unaligned D).
        mix2 = mix.astype(mxu_dtype).reshape(bb * lq, d)
        o2 = o.reshape(bb * lq, d)
        pre = (jnp.dot(mix2, w1_ref[...], preferred_element_type=jnp.float32)
               + jnp.dot(o2, w2_ref[...], preferred_element_type=jnp.float32))
    pre = pre + b_ref[...].astype(jnp.float32)
    y_ref[...] = jnp.tanh(pre).reshape(bb, lq, d).astype(y_ref.dtype)


def attention_forward(output, context, weight, bias, *, mxu_dtype=None):
    """output: (B, Lq, D), context: (B, Lk, D),
    weight: (D, 2D) (torch nn.Linear layout), bias: (D,).
    Returns (attended output (B, Lq, D), attn (B, Lq, Lk))."""
    B, Lq, D = output.shape
    Bc, Lk, Dc = context.shape
    assert Bc == B and Dc == D
    assert weight.shape == (D, 2 * D) and bias.shape == (D,)
    dtype = output.dtype
    if mxu_dtype is None:
        # bf16 MXU operands when inputs are f32 (the MXU is bf16-native);
        # masking / softmax / accumulation stay f32 inside the kernel.
        mxu_dtype = jnp.bfloat16 if dtype == jnp.float32 else dtype
    mxu_dtype = jnp.dtype(mxu_dtype)

    vmem_bytes, num_cores = _tpu_info()
    # Never request the full physical VMEM (leave headroom for Mosaic scratch):
    # ~48 MiB on v7x (64 MiB physical), ~96 MiB on v5e/v6e (128 MiB physical).
    vmem_limit = max(32 * 1024 * 1024, (vmem_bytes * 3) // 4)
    vmem_budget = (vmem_limit * 4) // 5

    # ---- Conditional HBM padding (only when inflation is small). ----------
    Lqp = _maybe_pad_dim(Lq, _sublane_tile(dtype))
    Lkp = _maybe_pad_dim(Lk, 128)
    Dp = _maybe_pad_dim(D, 128)

    out_p = output
    ctx_p = context
    if (Lqp, Dp) != (Lq, D):
        out_p = jnp.pad(output, ((0, 0), (0, Lqp - Lq), (0, Dp - D)))
    if (Lkp, Dp) != (Lk, D):
        ctx_p = jnp.pad(context, ((0, 0), (0, Lkp - Lk), (0, Dp - D)))

    # Split the Linear weight into the half acting on `mix` and the half acting
    # on `output`, pre-transposed for row-major matmuls, zero padded.
    w1 = jnp.transpose(weight[:, :D])
    w2 = jnp.transpose(weight[:, D:])
    if Dp != D:
        w1 = jnp.pad(w1, ((0, Dp - D), (0, Dp - D)))
        w2 = jnp.pad(w2, ((0, Dp - D), (0, Dp - D)))
    b2d = bias.reshape(1, D).astype(jnp.float32)
    if Dp != D:
        b2d = jnp.pad(b2d, ((0, 0), (0, Dp - D)))

    fuse_linear = (Dp % 128 == 0)
    if fuse_linear:
        w_inputs = (jnp.concatenate([w1, w2], axis=0).astype(mxu_dtype),)
    else:
        w_inputs = (w1.astype(mxu_dtype), w2.astype(mxu_dtype))

    # ---- Batch-block the grid (generation-aware). --------------------------
    in_bytes = jnp.dtype(dtype).itemsize
    Bb = _choose_batch_block(B, Lqp, Lkp, Dp, in_bytes, mxu_dtype.itemsize,
                             vmem_budget, num_cores)
    Bp = _round_up(B, Bb)
    if Bp != B:
        out_p = jnp.pad(out_p, ((0, Bp - B), (0, 0), (0, 0)))
        ctx_p = jnp.pad(ctx_p, ((0, Bp - B), (0, 0), (0, 0)))
    grid = (Bp // Bb,)

    kernel = functools.partial(
        _attention_kernel,
        n_valid_keys=(Lk if Lkp != Lk else None),
        mxu_dtype=mxu_dtype,
        fused_linear=fuse_linear)

    def build(single_buffer_weights):
        wkw = ({"pipeline_mode": pl.Buffered(1)}
               if single_buffer_weights else {})
        if fuse_linear:
            w_specs = [pl.BlockSpec((2 * Dp, Dp), lambda b: (0, 0), **wkw)]
        else:
            w_specs = [pl.BlockSpec((Dp, Dp), lambda b: (0, 0), **wkw),
                       pl.BlockSpec((Dp, Dp), lambda b: (0, 0), **wkw)]
        in_specs = [
            pl.BlockSpec((Bb, Lqp, Dp), lambda b: (b, 0, 0)),    # output
            pl.BlockSpec((Bb, Lkp, Dp), lambda b: (b, 0, 0)),    # context
            *w_specs,
            pl.BlockSpec((1, Dp), lambda b: (0, 0), **wkw),      # bias
        ]
        out_specs = (
            pl.BlockSpec((Bb, Lqp, Dp), lambda b: (b, 0, 0)),    # attended out
            pl.BlockSpec((Bb, Lqp, Lkp), lambda b: (b, 0, 0)),   # attn
        )
        return pl.pallas_call(
            kernel,
            out_shape=(jax.ShapeDtypeStruct((Bp, Lqp, Dp), dtype),
                       jax.ShapeDtypeStruct((Bp, Lqp, Lkp), dtype)),
            grid=grid,
            in_specs=in_specs,
            out_specs=out_specs,
            compiler_params=pltpu.CompilerParams(
                dimension_semantics=("parallel",),
                vmem_limit_bytes=int(vmem_limit)),
        )

    args = (out_p, ctx_p) + w_inputs + (b2d,)
    try:
        # Grid-invariant weights/bias: single pipeline buffer (their index_map
        # is constant, so a second buffer is pure VMEM waste).
        y_p, attn_p = build(True)(*args)
    except Exception:
        # pipeline_mode=pl.Buffered(1) unsupported here: fall back to the
        # default double-buffered blocks.
        y_p, attn_p = build(False)(*args)

    y = y_p if (Bp, Lqp, Dp) == (B, Lq, D) else y_p[:B, :Lq, :D]
    attn = attn_p if (Bp, Lqp, Lkp) == (B, Lq, Lk) else attn_p[:B, :Lq, :Lk]
    return y, attn


def _reference(output, context, weight, bias, operand_dtype=None):
    """Pure-JAX reference mirroring the PyTorch forward.

    operand_dtype=None   : full f32 math (precision=HIGHEST).
    operand_dtype=bf16   : matmul operands rounded exactly as the kernel rounds
                           them for the MXU (f32 accumulation everywhere)."""
    cast = ((lambda x: x) if operand_dtype is None
            else (lambda x: x.astype(operand_dtype)))
    hi = lax.Precision.HIGHEST
    scores = jnp.einsum("bqd,bkd->bqk", cast(output), cast(context),
                        precision=hi, preferred_element_type=jnp.float32)
    attn = jax.nn.softmax(scores, axis=-1)
    mix = jnp.einsum("bqk,bkd->bqd", cast(attn), cast(context),
                     precision=hi, preferred_element_type=jnp.float32)
    combined = jnp.concatenate([mix, output.astype(jnp.float32)], axis=-1)
    y = jnp.tanh(jnp.einsum("bqe,de->bqd", cast(combined), cast(weight),
                            precision=hi, preferred_element_type=jnp.float32)
                 + bias.astype(jnp.float32))
    return y, attn


if __name__ == "__main__":
    B, Lq, Lk, D = 8, 8, 6, 32

    key = jax.random.PRNGKey(0)
    k_out, k_ctx, k_w, k_b = jax.random.split(key, 4)

    output = jax.random.normal(k_out, (B, Lq, D), dtype=jnp.float32)
    context = jax.random.normal(k_ctx, (B, Lk, D), dtype=jnp.float32)

    # nn.Linear(dim*2, dim)-style init: U(-1/sqrt(fan_in), +1/sqrt(fan_in)).
    bound = 1.0 / math.sqrt(2 * D)
    weight = jax.random.uniform(k_w, (D, 2 * D), minval=-bound, maxval=bound,
                                dtype=jnp.float32)
    bias = jax.random.uniform(k_b, (D,), minval=-bound, maxval=bound,
                              dtype=jnp.float32)

    y, attn = attention_forward(output, context, weight, bias)
    jax.block_until_ready((y, attn))
    assert y.shape == (B, Lq, D) and attn.shape == (B, Lq, Lk)

    # Attention rows come from an exact f32 softmax -> must sum to 1.
    row_sums = jnp.sum(attn.astype(jnp.float32), axis=-1)
    assert jnp.allclose(row_sums, 1.0, atol=1e-3)

    # Structural check: reference with matmul operands rounded the same way the
    # kernel rounds them for the MXU (bf16 operands, f32 accumulation).
    y_mref, attn_mref = _reference(output, context, weight, bias,
                                   operand_dtype=jnp.bfloat16)
    assert jnp.allclose(y, y_mref, atol=1e-2, rtol=1e-2)
    assert jnp.allclose(attn, attn_mref, atol=1e-2, rtol=1e-2)

    # Sanity check vs the pure-f32 reference; looser tolerance covers the bf16
    # MXU-operand rounding at D=32.
    y_ref, attn_ref = _reference(output, context, weight, bias)
    assert jnp.allclose(y, y_ref, atol=5e-2, rtol=5e-2)
    assert jnp.allclose(attn, attn_ref, atol=5e-2, rtol=5e-2)

    print("KERNEL_OK")
</pallas_src>

<mosaic_0001>
module attributes {stable_mosaic.version = 11 : i64} {
  func.func @_attention_kernel(%arg0: i32, %arg1: memref<8x8x32xf32, #tpu.memory_space<vmem>>, %arg2: memref<8x6x32xf32, #tpu.memory_space<vmem>>, %arg3: memref<32x32xbf16, #tpu.memory_space<vmem>>, %arg4: memref<32x32xbf16, #tpu.memory_space<vmem>>, %arg5: memref<1x32xf32, #tpu.memory_space<vmem>>, %arg6: memref<8x8x32xf32, #tpu.memory_space<vmem>>, %arg7: memref<8x8x6xf32, #tpu.memory_space<vmem>>) attributes {dimension_semantics = [#tpu.dimension_semantics<parallel>], iteration_bounds = array<i64: 1>, scalar_prefetch = 0 : i64, scratch_operands = 0 : i64, tpu.core_type = #tpu.core_type<tc>, window_params = [{transform_indices = @transform_0, window_bounds = array<i64: 8, 8, 32>}, {transform_indices = @transform_1, window_bounds = array<i64: 8, 6, 32>}, {pipeline_mode = #tpu.pipeline_mode<synchronous>, transform_indices = @transform_2, window_bounds = array<i64: 32, 32>}, {pipeline_mode = #tpu.pipeline_mode<synchronous>, transform_indices = @transform_3, window_bounds = array<i64: 32, 32>}, {pipeline_mode = #tpu.pipeline_mode<synchronous>, transform_indices = @transform_4, window_bounds = array<i64: 1, 32>}, {transform_indices = @transform_5, window_bounds = array<i64: 8, 8, 32>}, {transform_indices = @transform_6, window_bounds = array<i64: 8, 8, 6>}]} {
    %c0 = arith.constant 0 : index
    %c0_0 = arith.constant 0 : index
    %c0_1 = arith.constant 0 : index
    %0 = vector.load %arg1[%c0, %c0_0, %c0_1] : memref<8x8x32xf32, #tpu.memory_space<vmem>>, vector<8x8x32xf32>
    %1 = arith.truncf %0 : vector<8x8x32xf32> to vector<8x8x32xbf16>
    %c0_2 = arith.constant 0 : index
    %c0_3 = arith.constant 0 : index
    %c0_4 = arith.constant 0 : index
    %2 = vector.load %arg2[%c0_2, %c0_3, %c0_4] : memref<8x6x32xf32, #tpu.memory_space<vmem>>, vector<8x6x32xf32>
    %3 = arith.truncf %2 : vector<8x6x32xf32> to vector<8x6x32xbf16>
    %cst = arith.constant dense<0.000000e+00> : vector<8x8x6xf32>
    %4 = tpu.matmul %1, %3, %cst {dimension_numbers = #tpu.dot_dimension_numbers<[2], [2], [1], [1], [0, 0, 0, 1, 1, 1], [0], [0]>} : vector<8x8x32xbf16>, vector<8x6x32xbf16>, vector<8x8x6xf32> -> vector<8x8x6xf32>
    %cst_5 = arith.constant dense<0xFF800000> : vector<8x8xf32>
    %5 = vector.multi_reduction <maximumf>, %4, %cst_5 [2] : vector<8x8x6xf32> to vector<8x8xf32>
    %6 = vector.shape_cast %5 : vector<8x8xf32> to vector<8x8x1xf32>
    %7 = vector.broadcast %6 : vector<8x8x1xf32> to vector<8x8x6xf32>
    %8 = arith.subf %4, %7 : vector<8x8x6xf32>
    %9 = math.exp %8 : vector<8x8x6xf32>
    %cst_6 = arith.constant dense<0.000000e+00> : vector<8x8xf32>
    %10 = vector.multi_reduction <add>, %9, %cst_6 [2] : vector<8x8x6xf32> to vector<8x8xf32>
    %11 = vector.shape_cast %10 : vector<8x8xf32> to vector<8x8x1xf32>
    %12 = vector.broadcast %11 : vector<8x8x1xf32> to vector<8x8x6xf32>
    %13 = arith.divf %9, %12 : vector<8x8x6xf32>
    %c0_7 = arith.constant 0 : index
    %c0_8 = arith.constant 0 : index
    %c0_9 = arith.constant 0 : index
    %14 = vector.load %arg7[%c0_7, %c0_8, %c0_9] : memref<8x8x6xf32, #tpu.memory_space<vmem>>, vector<8x8x6xf32>
    tpu.vector_store %arg7[%c0_7, %c0_8, %c0_9], %13 {strides = array<i32>} : memref<8x8x6xf32, #tpu.memory_space<vmem>>, vector<8x8x6xf32>,
    %15 = arith.truncf %13 : vector<8x8x6xf32> to vector<8x8x6xbf16>
    %cst_10 = arith.constant dense<0.000000e+00> : vector<8x8x32xf32>
    %16 = tpu.matmul %15, %3, %cst_10 {dimension_numbers = #tpu.dot_dimension_numbers<[2], [1], [1], [2], [0, 0, 0, 1, 1, 2], [0], [0]>} : vector<8x8x6xbf16>, vector<8x6x32xbf16>, vector<8x8x32xf32> -> vector<8x8x32xf32>
    %17 = arith.truncf %16 : vector<8x8x32xf32> to vector<8x8x32xbf16>
    %18 = vector.shape_cast %17 : vector<8x8x32xbf16> to vector<64x32xbf16>
    %19 = vector.shape_cast %1 : vector<8x8x32xbf16> to vector<64x32xbf16>
    %c0_11 = arith.constant 0 : index
    %c0_12 = arith.constant 0 : index
    %20 = vector.load %arg3[%c0_11, %c0_12] : memref<32x32xbf16, #tpu.memory_space<vmem>>, vector<32x32xbf16>
    %cst_13 = arith.constant dense<0.000000e+00> : vector<64x32xf32>
    %21 = tpu.matmul %18, %20, %cst_13 {dimension_numbers = #tpu.dot_dimension_numbers<[1], [0], [0], [1], [0, 0, 1, 1], [], []>} : vector<64x32xbf16>, vector<32x32xbf16>, vector<64x32xf32> -> vector<64x32xf32>
    %c0_14 = arith.constant 0 : index
    %c0_15 = arith.constant 0 : index
    %22 = vector.load %arg4[%c0_14, %c0_15] : memref<32x32xbf16, #tpu.memory_space<vmem>>, vector<32x32xbf16>
    %cst_16 = arith.constant dense<0.000000e+00> : vector<64x32xf32>
    %23 = tpu.matmul %19, %22, %cst_16 {dimension_numbers = #tpu.dot_dimension_numbers<[1], [0], [0], [1], [0, 0, 1, 1], [], []>} : vector<64x32xbf16>, vector<32x32xbf16>, vector<64x32xf32> -> vector<64x32xf32>
    %24 = arith.addf %21, %23 : vector<64x32xf32>
    %c0_17 = arith.constant 0 : index
    %c0_18 = arith.constant 0 : index
    %25 = vector.load %arg5[%c0_17, %c0_18] : memref<1x32xf32, #tpu.memory_space<vmem>>, vector<1x32xf32>
    %26 = vector.broadcast %25 : vector<1x32xf32> to vector<64x32xf32>
    %27 = arith.addf %24, %26 : vector<64x32xf32>
    %28 = math.tanh %27 : vector<64x32xf32>
    %29 = vector.shape_cast %28 : vector<64x32xf32> to vector<8x8x32xf32>
    %c0_19 = arith.constant 0 : index
    %c0_20 = arith.constant 0 : index
    %c0_21 = arith.constant 0 : index
    %30 = vector.load %arg6[%c0_19, %c0_20, %c0_21] : memref<8x8x32xf32, #tpu.memory_space<vmem>>, vector<8x8x32xf32>
    tpu.vector_store %arg6[%c0_19, %c0_20, %c0_21], %29 {strides = array<i32>} : memref<8x8x32xf32, #tpu.memory_space<vmem>>, vector<8x8x32xf32>,
    return
  }
  func.func @transform_0(%arg0: i32) -> (i32, i32, i32) {
    %c0_i32 = arith.constant 0 : i32
    %c0_i32_0 = arith.constant 0 : i32
    %c0_i32_1 = arith.constant 0 : i32
    return %arg0, %c0_i32, %c0_i32_0 : i32, i32, i32
  }
  func.func @transform_1(%arg0: i32) -> (i32, i32, i32) {
    %c0_i32 = arith.constant 0 : i32
    %c0_i32_0 = arith.constant 0 : i32
    %c0_i32_1 = arith.constant 0 : i32
    return %arg0, %c0_i32, %c0_i32_0 : i32, i32, i32
  }
  func.func @transform_2(%arg0: i32) -> (i32, i32) {
    %c0_i32 = arith.constant 0 : i32
    %c0_i32_0 = arith.constant 0 : i32
    %c0_i32_1 = arith.constant 0 : i32
    return %c0_i32, %c0_i32_0 : i32, i32
  }
  func.func @transform_3(%arg0: i32) -> (i32, i32) {
    %c0_i32 = arith.constant 0 : i32
    %c0_i32_0 = arith.constant 0 : i32
    %c0_i32_1 = arith.constant 0 : i32
    return %c0_i32, %c0_i32_0 : i32, i32
  }
  func.func @transform_4(%arg0: i32) -> (i32, i32) {
    %c0_i32 = arith.constant 0 : i32
    %c0_i32_0 = arith.constant 0 : i32
    %c0_i32_1 = arith.constant 0 : i32
    return %c0_i32, %c0_i32_0 : i32, i32
  }
  func.func @transform_5(%arg0: i32) -> (i32, i32, i32) {
    %c0_i32 = arith.constant 0 : i32
    %c0_i32_0 = arith.constant 0 : i32
    %c0_i32_1 = arith.constant 0 : i32
    return %arg0, %c0_i32, %c0_i32_0 : i32, i32, i32
  }
  func.func @transform_6(%arg0: i32) -> (i32, i32, i32) {
    %c0_i32 = arith.constant 0 : i32
    %c0_i32_0 = arith.constant 0 : i32
    %c0_i32_1 = arith.constant 0 : i32
    return %arg0, %c0_i32, %c0_i32_0 : i32, i32, i32
  }
}

module attributes {stable_mosaic.version = 11 : i64} {
  func.func @_attention_kernel(%arg0: i32, %arg1: memref<8x8x32xf32, #tpu.memory_space<vmem>>, %arg2: memref<8x6x32xf32, #tpu.memory_space<vmem>>, %arg3: memref<32x32xbf16, #tpu.memory_space<vmem>>, %arg4: memref<32x32xbf16, #tpu.memory_space<vmem>>, %arg5: memref<1x32xf32, #tpu.memory_space<vmem>>, %arg6: memref<8x8x32xf32, #tpu.memory_space<vmem>>, %arg7: memref<8x8x6xf32, #tpu.memory_space<vmem>>) attributes {dimension_semantics = [#tpu.dimension_semantics<parallel>], iteration_bounds = array<i64: 1>, scalar_prefetch = 0 : i64, scratch_operands = 0 : i64, tpu.core_type = #tpu.core_type<tc>, window_params = [{transform_indices = @transform_0, window_bounds = array<i64: 8, 8, 32>}, {transform_indices = @transform_1, window_bounds = array<i64: 8, 6, 32>}, {pipeline_mode = #tpu.pipeline_mode<synchronous>, transform_indices = @transform_2, window_bounds = array<i64: 32, 32>}, {pipeline_mode = #tpu.pipeline_mode<synchronous>, transform_indices = @transform_3, window_bounds = array<i64: 32, 32>}, {pipeline_mode = #tpu.pipeline_mode<synchronous>, transform_indices = @transform_4, window_bounds = array<i64: 1, 32>}, {transform_indices = @transform_5, window_bounds = array<i64: 8, 8, 32>}, {transform_indices = @transform_6, window_bounds = array<i64: 8, 8, 6>}]} {
    %c0 = arith.constant 0 : index
    %c0_0 = arith.constant 0 : index
    %c0_1 = arith.constant 0 : index
    %0 = vector.load %arg1[%c0, %c0_0, %c0_1] : memref<8x8x32xf32, #tpu.memory_space<vmem>>, vector<8x8x32xf32>
    %1 = arith.truncf %0 : vector<8x8x32xf32> to vector<8x8x32xbf16>
    %c0_2 = arith.constant 0 : index
    %c0_3 = arith.constant 0 : index
    %c0_4 = arith.constant 0 : index
    %2 = vector.load %arg2[%c0_2, %c0_3, %c0_4] : memref<8x6x32xf32, #tpu.memory_space<vmem>>, vector<8x6x32xf32>
    %3 = arith.truncf %2 : vector<8x6x32xf32> to vector<8x6x32xbf16>
    %cst = arith.constant dense<0.000000e+00> : vector<8x8x6xf32>
    %4 = tpu.matmul %1, %3, %cst {dimension_numbers = #tpu.dot_dimension_numbers<[2], [2], [1], [1], [0, 0, 0, 1, 1, 1], [0], [0]>} : vector<8x8x32xbf16>, vector<8x6x32xbf16>, vector<8x8x6xf32> -> vector<8x8x6xf32>
    %cst_5 = arith.constant dense<0xFF800000> : vector<8x8xf32>
    %5 = vector.multi_reduction <maximumf>, %4, %cst_5 [2] : vector<8x8x6xf32> to vector<8x8xf32>
    %6 = vector.shape_cast %5 : vector<8x8xf32> to vector<8x8x1xf32>
    %7 = vector.broadcast %6 : vector<8x8x1xf32> to vector<8x8x6xf32>
    %8 = arith.subf %4, %7 : vector<8x8x6xf32>
    %9 = math.exp %8 : vector<8x8x6xf32>
    %cst_6 = arith.constant dense<0.000000e+00> : vector<8x8xf32>
    %10 = vector.multi_reduction <add>, %9, %cst_6 [2] : vector<8x8x6xf32> to vector<8x8xf32>
    %11 = vector.shape_cast %10 : vector<8x8xf32> to vector<8x8x1xf32>
    %12 = vector.broadcast %11 : vector<8x8x1xf32> to vector<8x8x6xf32>
    %13 = arith.divf %9, %12 : vector<8x8x6xf32>
    %c0_7 = arith.constant 0 : index
    %c0_8 = arith.constant 0 : index
    %c0_9 = arith.constant 0 : index
    %14 = vector.load %arg7[%c0_7, %c0_8, %c0_9] : memref<8x8x6xf32, #tpu.memory_space<vmem>>, vector<8x8x6xf32>
    tpu.vector_store %arg7[%c0_7, %c0_8, %c0_9], %13 {strides = array<i32>} : memref<8x8x6xf32, #tpu.memory_space<vmem>>, vector<8x8x6xf32>,
    %15 = arith.truncf %13 : vector<8x8x6xf32> to vector<8x8x6xbf16>
    %cst_10 = arith.constant dense<0.000000e+00> : vector<8x8x32xf32>
    %16 = tpu.matmul %15, %3, %cst_10 {dimension_numbers = #tpu.dot_dimension_numbers<[2], [1], [1], [2], [0, 0, 0, 1, 1, 2], [0], [0]>} : vector<8x8x6xbf16>, vector<8x6x32xbf16>, vector<8x8x32xf32> -> vector<8x8x32xf32>
    %17 = arith.truncf %16 : vector<8x8x32xf32> to vector<8x8x32xbf16>
    %18 = vector.shape_cast %17 : vector<8x8x32xbf16> to vector<64x32xbf16>
    %19 = vector.shape_cast %1 : vector<8x8x32xbf16> to vector<64x32xbf16>
    %c0_11 = arith.constant 0 : index
    %c0_12 = arith.constant 0 : index
    %20 = vector.load %arg3[%c0_11, %c0_12] : memref<32x32xbf16, #tpu.memory_space<vmem>>, vector<32x32xbf16>
    %cst_13 = arith.constant dense<0.000000e+00> : vector<64x32xf32>
    %21 = tpu.matmul %18, %20, %cst_13 {dimension_numbers = #tpu.dot_dimension_numbers<[1], [0], [0], [1], [0, 0, 1, 1], [], []>} : vector<64x32xbf16>, vector<32x32xbf16>, vector<64x32xf32> -> vector<64x32xf32>
    %c0_14 = arith.constant 0 : index
    %c0_15 = arith.constant 0 : index
    %22 = vector.load %arg4[%c0_14, %c0_15] : memref<32x32xbf16, #tpu.memory_space<vmem>>, vector<32x32xbf16>
    %cst_16 = arith.constant dense<0.000000e+00> : vector<64x32xf32>
    %23 = tpu.matmul %19, %22, %cst_16 {dimension_numbers = #tpu.dot_dimension_numbers<[1], [0], [0], [1], [0, 0, 1, 1], [], []>} : vector<64x32xbf16>, vector<32x32xbf16>, vector<64x32xf32> -> vector<64x32xf32>
    %24 = arith.addf %21, %23 : vector<64x32xf32>
    %c0_17 = arith.constant 0 : index
    %c0_18 = arith.constant 0 : index
    %25 = vector.load %arg5[%c0_17, %c0_18] : memref<1x32xf32, #tpu.memory_space<vmem>>, vector<1x32xf32>
    %26 = vector.broadcast %25 : vector<1x32xf32> to vector<64x32xf32>
    %27 = arith.addf %24, %26 : vector<64x32xf32>
    %28 = math.tanh %27 : vector<64x32xf32>
    %29 = vector.shape_cast %28 : vector<64x32xf32> to vector<8x8x32xf32>
    %c0_19 = arith.constant 0 : index
    %c0_20 = arith.constant 0 : index
    %c0_21 = arith.constant 0 : index
    %30 = vector.load %arg6[%c0_19, %c0_20, %c0_21] : memref<8x8x32xf32, #tpu.memory_space<vmem>>, vector<8x8x32xf32>
    tpu.vector_store %arg6[%c0_19, %c0_20, %c0_21], %29 {strides = array<i32>} : memref<8x8x32xf32, #tpu.memory_space<vmem>>, vector<8x8x32xf32>,
    return
  }
  func.func @transform_0(%arg0: i32) -> (i32, i32, i32) {
    %c0_i32 = arith.constant 0 : i32
    %c0_i32_0 = arith.constant 0 : i32
    %c0_i32_1 = arith.constant 0 : i32
    return %arg0, %c0_i32, %c0_i32_0 : i32, i32, i32
  }
  func.func @transform_1(%arg0: i32) -> (i32, i32, i32) {
    %c0_i32 = arith.constant 0 : i32
    %c0_i32_0 = arith.constant 0 : i32
    %c0_i32_1 = arith.constant 0 : i32
    return %arg0, %c0_i32, %c0_i32_0 : i32, i32, i32
  }
  func.func @transform_2(%arg0: i32) -> (i32, i32) {
    %c0_i32 = arith.constant 0 : i32
    %c0_i32_0 = arith.constant 0 : i32
    %c0_i32_1 = arith.constant 0 : i32
    return %c0_i32, %c0_i32_0 : i32, i32
  }
  func.func @transform_3(%arg0: i32) -> (i32, i32) {
    %c0_i32 = arith.constant 0 : i32
    %c0_i32_0 = arith.constant 0 : i32
    %c0_i32_1 = arith.constant 0 : i32
    return %c0_i32, %c0_i32_0 : i32, i32
  }
  func.func @transform_4(%arg0: i32) -> (i32, i32) {
    %c0_i32 = arith.constant 0 : i32
    %c0_i32_0 = arith.constant 0 : i32
    %c0_i32_1 = arith.constant 0 : i32
    return %c0_i32, %c0_i32_0 : i32, i32
  }
  func.func @transform_5(%arg0: i32) -> (i32, i32, i32) {
    %c0_i32 = arith.constant 0 : i32
    %c0_i32_0 = arith.constant 0 : i32
    %c0_i32_1 = arith.constant 0 : i32
    return %arg0, %c0_i32, %c0_i32_0 : i32, i32, i32
  }
  func.func @transform_6(%arg0: i32) -> (i32, i32, i32) {
    %c0_i32 = arith.constant 0 : i32
    %c0_i32_0 = arith.constant 0 : i32
    %c0_i32_1 = arith.constant 0 : i32
    return %arg0, %c0_i32, %c0_i32_0 : i32, i32, i32
  }
}

</mosaic_0001>

<bundles_post_ra>
// kernel: tpu_custom_call.1
= control target key start
LH: loop header
LB: loop body
LE: loop exit
PB: predicated region body
PF: predicated region fallthrough
CT: control target
= control target key end

     0   :  { %vm56_vm0 = vcmask 261120   ;;  %v1474_v2 = vmov 0.0   ;;  %vm1475_vm1 = vmmov 0   ;;  %s1821_s0 = inlined_call_operand.vmem [shape: f32[8,8,32], index: 0, kind: input, shape index: {}]   ;;  %s1822_s1 = inlined_call_operand.vmem [shape: f32[8,6,32], index: 1, kind: input, shape index: {}]   ;;  %s1823_s2 = inlined_call_operand.vmem [shape: bf16[32,32], index: 2, kind: input, shape index: {}]   ;;  %s1824_s3 = inlined_call_operand.vmem [shape: bf16[32,32], index: 3, kind: input, shape index: {}]   ;;  %s1825_s4 = inlined_call_operand.vmem [shape: f32[1,32], index: 4, kind: input, shape index: {}]   ;;  %s1826_s5 = inlined_call_operand.hbm [shape: f32[8,8,32], index: 5, kind: output, shape index: {0}]   ;;  %s1827_s6 = inlined_call_operand.vmem [shape: f32[8,8,6], index: 6, kind: output, shape index: {1}]  }
   0x1   :  { %v40_v0 = vld [vmem:[%s1822_s1] sm:$0x3f]  ;;  %v41_v1 = vld [vmem:[%s1822_s1 + $0x8] sm:$0x3f]  ;;  %1265 = vmatprep.subr.bf16.mxu0 %v1474_v2  ;;  %1271 = vmatprep.subr.bf16.mxu1 %v1474_v2  ;;  %v42_v5 = vld [vmem:[%s1822_s1 + $0x10] sm:$0x3f] }
   0x2   :  { %v1522_v3 = vpack.c.bf16 %v40_v0, %v40_v0  ;;  %v1524_v4 = vpack.c.bf16 %v41_v1, %v41_v1  ;;  %1267 = vmatprep.mubr.msk.bf16.mxu0 %vm1475_vm1, %v1474_v2  ;;  %1273 = vmatprep.mubr.msk.bf16.mxu1 %vm1475_vm1, %v1474_v2  ;;  %v43_v6 = vld [vmem:[%s1822_s1 + $0x18] sm:$0x3f]  ;;  %v1543_v9 = vld [vmem:[%s1821_s0] sm:$0xff]  ;;  %v1548_v10 = vld [vmem:[%s1821_s0 + $0x8] sm:$0xff]  ;;  %v1550_v11 = vpack.c.bf16 %v42_v5, %v42_v5 }
   0x3   :  { %v1552_v12 = vpack.c.bf16 %v43_v6, %v43_v6  ;;  %v32_v13 = vpack.c.bf16 %v1543_v9, %v1543_v9  ;;  %v33_v14 = vpack.c.bf16 %v1548_v10, %v1548_v10 }
   0x4   :  { %v61_v7 = vsel %vm56_vm0, %v1522_v3, 0  ;;  %v107_v8 = vsel %vm56_vm0, %v1524_v4, 0  ;;  %v153_v15 = vsel %vm56_vm0, %v1550_v11, 0 }
   0x5   :  { %1266 = vmatpush3.bf16.xpose.msra.mxu0 %v61_v7  ;;  %1272 = vmatpush3.bf16.xpose.msra.mxu1 %v107_v8  ;;  %v199_v16 = vsel %vm56_vm0, %v1552_v12, 0 }
   0x6   :  { %1277 = vmatprep.subr.bf16.mxu0 %v1474_v2  ;;  %1283 = vmatprep.subr.bf16.mxu1 %v1474_v2 }
   0x7   :  { %12 = vsyncpa [#allocation3], 0  ;;  %v44_v17 = vld [vmem:[%s1822_s1 + $0x20] sm:$0x3f]  ;;  %v45_v18 = vld [vmem:[%s1822_s1 + $0x28] sm:$0x3f] }
   0x8   :  { %v1575_v19 = vld [vmem:[%s1821_s0 + $0x10] sm:$0xff]  ;;  %v1580_v20 = vld [vmem:[%s1821_s0 + $0x18] sm:$0xff]  ;;  %v1586_v21 = vpack.c.bf16 %v44_v17, %v44_v17  ;;  %v1588_v22 = vpack.c.bf16 %v45_v18, %v45_v18  ;;  %v1611_v29 = vld [vmem:[%s1821_s0 + $0x20] sm:$0xff]  ;;  %vm425_vm2 = vcmask 48128   ;;  %vm533_vm3 = vcmask 1042432  }
   0x9   :  { %v34_v23 = vpack.c.bf16 %v1575_v19, %v1575_v19  ;;  %v35_v24 = vpack.c.bf16 %v1580_v20, %v1580_v20  ;;  %v46_v27 = vld [vmem:[%s1822_s1 + $0x30] sm:$0x3f]  ;;  %v47_v28 = vld [vmem:[%s1822_s1 + $0x38] sm:$0x3f]  ;;  %v1616_v30 = vld [vmem:[%s1821_s0 + $0x28] sm:$0xff]  ;;  %v36_v33 = vpack.c.bf16 %v1611_v29, %v1611_v29 }
   0xa   :  { %v245_v25 = vsel %vm56_vm0, %v1586_v21, 0  ;;  %v291_v26 = vsel %vm56_vm0, %v1588_v22, 0  ;;  %v1622_v31 = vpack.c.bf16 %v46_v27, %v46_v27  ;;  %v1624_v32 = vpack.c.bf16 %v47_v28, %v47_v28  ;;  %v1641_v37 = vld [vmem:[%s1821_s0 + $0x30] sm:$0xff]  ;;  %v1646_v38 = vld [vmem:[%s1821_s0 + $0x38] sm:$0xff] }
   0xb   :  { %v37_v34 = vpack.c.bf16 %v1616_v30, %v1616_v30  ;;  %v38_v39 = vpack.c.bf16 %v1641_v37, %v1641_v37  ;;  %v39_v40 = vpack.c.bf16 %v1646_v38, %v1646_v38 }
   0xc   :  { %1268 = vmatmul.mubr.msk.bf16.vlgmr.msra.gmra.mrb[0].mxu0 %vm56_vm0, %v32_v13  ;;  %1274 = vmatmul.mubr.msk.bf16.vlgmr.msra.gmra.mrb[0].mxu1 %vm56_vm0, %v33_v14  ;;  %v337_v35 = vsel %vm56_vm0, %v1622_v31, 0  ;;  %v383_v36 = vsel %vm56_vm0, %v1624_v32, 0 }
   0xd   :  { %1278 = vmatpush3.bf16.xpose.msra.mxu0 %v153_v15  ;;  %1284 = vmatpush3.bf16.xpose.msra.mxu1 %v199_v16 }
   0xe   :  { %1279 = vmatprep.mubr.msk.bf16.mxu0 %vm1475_vm1, %v1474_v2  ;;  %1285 = vmatprep.mubr.msk.bf16.mxu1 %vm1475_vm1, %v1474_v2 }
   0xf   :  { %1289 = vmatprep.subr.bf16.mxu0 %v1474_v2  ;;  %1295 = vmatprep.subr.bf16.mxu1 %v1474_v2 }
  0x14   :  { %1280 = vmatmul.mubr.msk.bf16.vlgmr.msra.gmra.mrb[4].mxu0 %vm56_vm0, %v34_v23  ;;  %1286 = vmatmul.mubr.msk.bf16.vlgmr.msra.gmra.mrb[4].mxu1 %vm56_vm0, %v35_v24 }
  0x15   :  { %1290 = vmatpush3.bf16.xpose.msra.mxu0 %v245_v25  ;;  %1296 = vmatpush3.bf16.xpose.msra.mxu1 %v291_v26 }
  0x16   :  { %1291 = vmatprep.mubr.msk.bf16.mxu0 %vm1475_vm1, %v1474_v2  ;;  %1297 = vmatprep.mubr.msk.bf16.mxu1 %vm1475_vm1, %v1474_v2 }
  0x17   :  { %1301 = vmatprep.subr.bf16.mxu0 %v1474_v2  ;;  %1307 = vmatprep.subr.bf16.mxu1 %v1474_v2 }
  0x1c   :  { %1292 = vmatmul.mubr.msk.bf16.vlgmr.msra.gmra.mrb[8].mxu0 %vm56_vm0, %v36_v33  ;;  %1298 = vmatmul.mubr.msk.bf16.vlgmr.msra.gmra.mrb[8].mxu1 %vm56_vm0, %v37_v34 }
  0x1d   :  { %1302 = vmatpush3.bf16.xpose.msra.mxu0 %v337_v35  ;;  %1308 = vmatpush3.bf16.xpose.msra.mxu1 %v383_v36 }
  0x1e   :  { %1303 = vmatprep.mubr.msk.bf16.mxu0 %vm1475_vm1, %v1474_v2  ;;  %1309 = vmatprep.mubr.msk.bf16.mxu1 %vm1475_vm1, %v1474_v2 }
  0x1f   :  { %1313 = vmatprep.subr.bf16.mxu0 %v1474_v2  ;;  %1319 = vmatprep.subr.bf16.mxu1 %v1474_v2 }
  0x24   :  { %1304 = vmatmul.mubr.msk.bf16.vlgmr.msra.gmra.mrb[12].mxu0 %vm56_vm0, %v38_v39  ;;  %1310 = vmatmul.mubr.msk.bf16.vlgmr.msra.gmra.mrb[12].mxu1 %vm56_vm0, %v39_v40 }
  0x25   :  { %1315 = vmatprep.mubr.msk.bf16.mxu0 %vm1475_vm1, %v1474_v2  ;;  %1321 = vmatprep.mubr.msk.bf16.mxu1 %vm1475_vm1, %v1474_v2 }
  0xdf   :  { %v97_v41 = vpop.f32.mrb[0].mxu0  ;;  %v143_v42 = vpop.f32.mrb[0].mxu1 }
  0xe0   :  { %v1269_v43 = vpop.f32.mrb[1].mxu0  ;;  %v426_v44 = vsel %vm425_vm2, %v97_v41, -inf  ;;  %v1275_v45 = vpop.f32.mrb[1].mxu1  ;;  %v429_v50 = vsel %vm425_vm2, %v143_v42, -inf }
  0xe1   :  { %427 = vmax.xlane.f32.xlu0 %v426_v44  ;;  %v100_v46 = vpop.f32.mrb[2].mxu0  ;;  %v146_v47 = vpop.f32.mrb[2].mxu1 }
  0xe2   :  { %v1270_v48 = vpop.f32.mrb[3].mxu0  ;;  %v1276_v49 = vpop.f32.mrb[3].mxu1 }
  0xe5   :  { %430 = vmax.xlane.f32.xlu0 %v429_v50 }
  0xe7   :  { %v189_v51 = vpop.f32.mrb[4].mxu0  ;;  %v235_v52 = vpop.f32.mrb[4].mxu1 }
  0xe8   :  { %v1281_v53 = vpop.f32.mrb[5].mxu0  ;;  %v432_v54 = vsel %vm425_vm2, %v189_v51, -inf  ;;  %v1287_v55 = vpop.f32.mrb[5].mxu1  ;;  %v435_v60 = vsel %vm425_vm2, %v235_v52, -inf }
  0xe9   :  { %433 = vmax.xlane.f32.xlu1 %v432_v54  ;;  %v192_v56 = vpop.f32.mrb[6].mxu0  ;;  %v238_v57 = vpop.f32.mrb[6].mxu1 }
  0xea   :  { %v1282_v58 = vpop.f32.mrb[7].mxu0  ;;  %v1288_v59 = vpop.f32.mrb[7].mxu1 }
  0xed   :  { %436 = vmax.xlane.f32.xlu1 %v435_v60 }
  0xef   :  { %v281_v61 = vpop.f32.mrb[8].mxu0  ;;  %v327_v62 = vpop.f32.mrb[8].mxu1 }
  0xf0   :  { %v441_v63 = vsel %vm425_vm2, %v327_v62, -inf  ;;  %v438_v0 = vsel %vm425_vm2, %v281_v61, -inf  ;;  %v1293_v1 = vpop.f32.mrb[9].mxu0  ;;  %v1299_v5 = vpop.f32.mrb[9].mxu1 }
  0xf1   :  { %442 = vmax.xlane.f32.xlu1 %v441_v63  ;;  %439 = vmax.xlane.f32.xlu0 %v438_v0  ;;  %v284_v6 = vpop.f32.mrb[10].mxu0  ;;  %v330_v7 = vpop.f32.mrb[10].mxu1 }
  0xf2   :  { %v1294_v8 = vpop.f32.mrb[11].mxu0  ;;  %v1300_v13 = vpop.f32.mrb[11].mxu1 }
  0xf7   :  { %v373_v14 = vpop.f32.mrb[12].mxu0  ;;  %v419_v15 = vpop.f32.mrb[12].mxu1 }
  0xf8   :  { %v447_v16 = vsel %vm425_vm2, %v419_v15, -inf  ;;  %v444_v17 = vsel %vm425_vm2, %v373_v14, -inf  ;;  %v1305_v18 = vpop.f32.mrb[13].mxu0  ;;  %v1311_v23 = vpop.f32.mrb[13].mxu1 }
  0xf9   :  { %448 = vmax.xlane.f32.xlu1 %v447_v16  ;;  %445 = vmax.xlane.f32.xlu0 %v444_v17  ;;  %v376_v24 = vpop.f32.mrb[14].mxu0  ;;  %v422_v25 = vpop.f32.mrb[14].mxu1  ;;  %v534_v17 = vsel %vm533_vm3, %v1522_v3, 0  ;;  %v579_v18 = vsel %vm533_vm3, %v1524_v4, 0  ;;  %v624_v4 = vsel %vm533_vm3, %v1550_v11, 0  ;;  %v669_v11 = vsel %vm533_vm3, %v1552_v12, 0 }
  0xfa   :  { %v1306_v26 = vpop.f32.mrb[15].mxu0  ;;  %v1312_v27 = vpop.f32.mrb[15].mxu1  ;;  %1314 = vmatpush3.bf16.msra.mxu0 %v534_v17  ;;  %1320 = vmatpush3.bf16.msra.mxu1 %v579_v18  ;;  %v714_v12 = vsel %vm533_vm3, %v1586_v21, 0  ;;  %v759_v21 = vsel %vm533_vm3, %v1588_v22, 0 }
  0xfb   :  { %1325 = vmatprep.subr.bf16.mxu0 %v1474_v2  ;;  %1331 = vmatprep.subr.bf16.mxu1 %v1474_v2 }
 0x16e   :  { %v428_v28 = vpop.xlane.xlu0 %427 }
 0x16f   :  { %v450_v33 = vsub.f32 %v97_v41, %v428_v28 }
 0x171   :  { %v458_v34 = vmul.f32 1.442695, %v450_v33 }
 0x172   :  { %v431_v35 = vpop.xlane.xlu0 %430 }
 0x173   :  { %1402 = vpow2.f32 %v458_v34  ;;  %v451_v36 = vsub.f32 %v143_v42, %v431_v35 }
 0x175   :  { %v460_v39 = vmul.f32 1.442695, %v451_v36 }
 0x176   :  { %v434_v40 = vpop.xlane.xlu1 %433 }
 0x177   :  { %1404 = vpow2.f32 %v460_v39  ;;  %v452_v43 = vsub.f32 %v189_v51, %v434_v40 }
 0x179   :  { %v462_v44 = vmul.f32 1.442695, %v452_v43 }
 0x17a   :  { %v437_v45 = vpop.xlane.xlu1 %436 }
 0x17b   :  { %1406 = vpow2.f32 %v462_v44  ;;  %v453_v46 = vsub.f32 %v235_v52, %v437_v45 }
 0x17d   :  { %v1403_v47 = vpop.eup %1402  ;;  %v464_v48 = vmul.f32 1.442695, %v453_v46 }
 0x17e   :  { %v443_v49 = vpop.xlane.xlu1 %442  ;;  %v440_v50 = vpop.xlane.xlu0 %439  ;;  %v474_v53 = vsel %vm425_vm2, %v1403_v47, 0.0 }
 0x17f   :  { %1408 = vpow2.f32 %v464_v48  ;;  %v455_v41 = vsub.f32 %v327_v62, %v443_v49  ;;  %v454_v54 = vsub.f32 %v281_v61, %v440_v50  ;;  %475 = vadd.xlane.f32.xlu0 %v474_v53 }
 0x181   :  { %v1405_v55 = vpop.eup %1404  ;;  %v468_v42 = vmul.f32 1.442695, %v455_v41  ;;  %v466_v56 = vmul.f32 1.442695, %v454_v54 }
 0x182   :  { %v477_v57 = vsel %vm425_vm2, %v1405_v55, 0.0 }
 0x183   :  { %1410 = vpow2.f32 %v468_v42  ;;  %478 = vadd.xlane.f32.xlu1 %v477_v57 }
 0x184   :  { %1412 = vpow2.f32 %v466_v56  ;;  %v849_v56 = vsel %vm533_vm3, %v1624_v32, 0 }
 0x185   :  { %v1407_v51 = vpop.eup %1406 }
 0x186   :  { %v449_v52 = vpop.xlane.xlu1 %448  ;;  %v446_v58 = vpop.xlane.xlu0 %445  ;;  %v480_v59 = vsel %vm425_vm2, %v1407_v51, 0.0 }
 0x187   :  { %v457_v60 = vsub.f32 %v419_v15, %v449_v52  ;;  %v456_v63 = vsub.f32 %v373_v14, %v446_v58  ;;  %481 = vadd.xlane.f32.xlu0 %v480_v59  ;;  %v1399_v59 = vld [vmem:[%s1823_s2] sm:$0xff]  }
 0x189   :  { %v1409_v0 = vpop.eup %1408  ;;  %v472_v62 = vmul.f32 1.442695, %v457_v60  ;;  %v470_v61 = vmul.f32 1.442695, %v456_v63  ;;  %v1400_v60 = vld [vmem:[%s1824_s3 + $0x8] sm:$0xff]  }
 0x18a   :  { %v483_v1 = vsel %vm425_vm2, %v1409_v0, 0.0  ;;  %v1401_v63 = vld [vmem:[%s1823_s2 + $0x8] sm:$0xff]  }
 0x18b   :  { %1414 = vpow2.f32 %v472_v62  ;;  %484 = vadd.xlane.f32.xlu1 %v483_v1  ;;  %v1214_v62 = vpack.c.bf16 %v1580_v20, %v1575_v19  ;;  %v1216_v1 = vpack.c.bf16 %v1646_v38, %v1641_v37 }
 0x18c   :  { %1416 = vpow2.f32 %v470_v61  ;;  %v1215_v61 = vpack.c.bf16 %v1616_v30, %v1611_v29 }
 0x18d   :  { %v1676_v5 = vpop.eup %1410 }
 0x18e   :  { %v1678_v6 = vpop.eup %1412  ;;  %v489_v7 = vsel %vm425_vm2, %v1676_v5, 0.0 }
 0x18f   :  { %490 = vadd.xlane.f32.xlu1 %v489_v7  ;;  %v486_v8 = vsel %vm425_vm2, %v1678_v6, 0.0 }
 0x190   :  { %487 = vadd.xlane.f32.xlu0 %v486_v8 }
 0x195   :  { %v1684_v13 = vpop.eup %1414 }
 0x196   :  { %v1686_v14 = vpop.eup %1416  ;;  %v495_v15 = vsel %vm425_vm2, %v1684_v13, 0.0 }
 0x197   :  { %496 = vadd.xlane.f32.xlu1 %v495_v15  ;;  %v492_v16 = vsel %vm425_vm2, %v1686_v14, 0.0 }
 0x198   :  { %493 = vadd.xlane.f32.xlu0 %v492_v16 }
 0x20c   :  { %v476_v23 = vpop.xlane.xlu0 %475 }
 0x20d   :  { %1418 = vrcp.f32 %v476_v23 }
 0x210   :  { %v479_v24 = vpop.xlane.xlu1 %478 }
 0x211   :  { %1420 = vrcp.f32 %v479_v24 }
 0x214   :  { %v482_v25 = vpop.xlane.xlu0 %481 }
 0x215   :  { %1422 = vrcp.f32 %v482_v25 }
 0x217   :  { %v1419_v26 = vpop.eup %1418 }
 0x218   :  { %v499_v27 = vmul.f32 %v1419_v26, %v1403_v47  ;;  %v485_v28 = vpop.xlane.xlu1 %484 }
 0x219   :  { %1424 = vrcp.f32 %v485_v28 }
 0x21a   :  { %514 = vst.msk [vmem:[%s1827_s6] sm:$0xff] %vm425_vm2, %v499_v27  ;;  %v522_v3 = vpack.c.bf16 %v499_v27, %v499_v27 }
 0x21b   :  { %v1421_v33 = vpop.eup %1420 }
 0x21c   :  { %v501_v34 = vmul.f32 %v1421_v33, %v1405_v55  ;;  %v491_v35 = vpop.xlane.xlu1 %490  ;;  %1316 = vmatmul.mubr.msk.bf16.vlgmr.msra.gmra.mrb[16].mxu0 %vm425_vm2, %v522_v3  ;;  %v804_v55 = vsel %vm533_vm3, %v1622_v31, 0 }
 0x21d   :  { %1426 = vrcp.f32 %v491_v35  ;;  %v488_v36 = vpop.xlane.xlu0 %487  ;;  %1326 = vmatpush3.bf16.msra.mxu0 %v624_v4  ;;  %1327 = vmatprep.mubr.msk.bf16.mxu0 %vm1475_vm1, %v1474_v2 }
 0x21e   :  { %515 = vst.msk [vmem:[%s1827_s6 + $0x8] sm:$0xff] %vm425_vm2, %v501_v34  ;;  %1428 = vrcp.f32 %v488_v36  ;;  %v523_v39 = vpack.c.bf16 %v501_v34, %v501_v34  ;;  %1337 = vmatprep.subr.bf16.mxu0 %v1474_v2 }
 0x21f   :  { %v1423_v40 = vpop.eup %1422 }
 0x220   :  { %v503_v43 = vmul.f32 %v1423_v40, %v1407_v51  ;;  %1322 = vmatmul.mubr.msk.bf16.vlgmr.msra.gmra.mrb[16].mxu1 %vm425_vm2, %v523_v39 }
 0x221   :  { %1332 = vmatpush3.bf16.msra.mxu1 %v669_v11  ;;  %1333 = vmatprep.mubr.msk.bf16.mxu1 %vm1475_vm1, %v1474_v2 }
 0x222   :  { %516 = vst.msk [vmem:[%s1827_s6 + $0x10] sm:$0xff] %vm425_vm2, %v503_v43  ;;  %v524_v44 = vpack.c.bf16 %v503_v43, %v503_v43  ;;  %1343 = vmatprep.subr.bf16.mxu1 %v1474_v2 }
 0x223   :  { %v1425_v45 = vpop.eup %1424 }
 0x224   :  { %v505_v46 = vmul.f32 %v1425_v45, %v1409_v0  ;;  %v497_v47 = vpop.xlane.xlu1 %496  ;;  %1328 = vmatmul.mubr.msk.bf16.vlgmr.msra.gmra.mrb[20].mxu0 %vm425_vm2, %v524_v44  ;;  %v1213_v0 = vpack.c.bf16 %v1548_v10, %v1543_v9 }
 0x225   :  { %1430 = vrcp.f32 %v497_v47  ;;  %v494_v48 = vpop.xlane.xlu0 %493  ;;  %1338 = vmatpush3.bf16.msra.mxu0 %v714_v12  ;;  %1339 = vmatprep.mubr.msk.bf16.mxu0 %vm1475_vm1, %v1474_v2 }
 0x226   :  { %517 = vst.msk [vmem:[%s1827_s6 + $0x18] sm:$0xff] %vm425_vm2, %v505_v46  ;;  %1432 = vrcp.f32 %v494_v48  ;;  %v525_v49 = vpack.c.bf16 %v505_v46, %v505_v46  ;;  %1349 = vmatprep.subr.bf16.mxu0 %v1474_v2 }
 0x227   :  { %v1427_v50 = vpop.eup %1426 }
 0x228   :  { %v1429_v53 = vpop.eup %1428  ;;  %v509_v41 = vmul.f32 %v1427_v50, %v1676_v5  ;;  %1334 = vmatmul.mubr.msk.bf16.vlgmr.msra.gmra.mrb[20].mxu1 %vm425_vm2, %v525_v49 }
 0x229   :  { %v507_v54 = vmul.f32 %v1429_v53, %v1678_v6  ;;  %1344 = vmatpush3.bf16.msra.mxu1 %v759_v21  ;;  %1345 = vmatprep.mubr.msk.bf16.mxu1 %vm1475_vm1, %v1474_v2 }
 0x22a   :  { %519 = vst.msk [vmem:[%s1827_s6 + $0x28] sm:$0xff] %vm425_vm2, %v509_v41  ;;  %1355 = vmatprep.subr.bf16.mxu1 %v1474_v2  ;;  %v527_v42 = vpack.c.bf16 %v509_v41, %v509_v41 }
 0x22b   :  { %518 = vst.msk [vmem:[%s1827_s6 + $0x20] sm:$0xff] %vm425_vm2, %v507_v54  ;;  %v526_v22 = vpack.c.bf16 %v507_v54, %v507_v54  ;;  %v1212_v54 = vld [vmem:[%s1825_s4] ss:$0 sm:$0xff]  ;;  %s1476_s4 = smov [#allocation2]  }
 0x22c   :  { %s1161_s25 = sshll.u32 %s1476_s4, 4  ;;  %s1162_s25 = int_to_ptr.vmem [resolvable:$true] %s1161_s25 }
 0x22d   :  { %1340 = vmatmul.mubr.msk.bf16.vlgmr.msra.gmra.mrb[24].mxu0 %vm425_vm2, %v526_v22  ;;  %s1450_s26 = scalar_lea.vmem %s1162_s25, 1024  ;;  %p1455_p1 = scmp.lt.s32.totalorder %s1162_s25, %s1162_s25 }
 0x22e   :  { %1350 = vmatpush3.bf16.msra.mxu0 %v804_v55  ;;  %1351 = vmatprep.mubr.msk.bf16.mxu0 %vm1475_vm1, %v1474_v2  ;;  %p1451_p0 = scmp.ne.s32.totalorder %s1162_s25, %s1450_s26  ;;  %p1456_p2 = scmp.lt.s32.totalorder %s1450_s26, %s1450_s26 }
 0x22f   :  { %v1431_v57 = vpop.eup %1430  ;;  %1373 = vmatprep.subr.bf16.mxu0 %v1399_v59 }
 0x230   :  { %v1433_v51 = vpop.eup %1432  ;;  %v513_v52 = vmul.f32 %v1431_v57, %v1684_v13  ;;  %1346 = vmatmul.mubr.msk.bf16.vlgmr.msra.gmra.mrb[24].mxu1 %vm425_vm2, %v527_v42  ;;  %p1457_p3 = por %p1456_p2, %p1455_p1 }
 0x231   :  { %v511_v58 = vmul.f32 %v1433_v51, %v1686_v14  ;;  %1356 = vmatpush3.bf16.msra.mxu1 %v849_v56  ;;  %1357 = vmatprep.mubr.msk.bf16.mxu1 %vm1475_vm1, %v1474_v2  ;;  %v1398_v2 = vld [vmem:[%s1824_s3] sm:$0xff]  }
 0x232   :  { %521 = vst.msk [vmem:[%s1827_s6 + $0x38] sm:$0xff] %vm425_vm2, %v513_v52  ;;  %v529_v32 = vpack.c.bf16 %v513_v52, %v513_v52  ;;  %1361 = vmatprep.subr.bf16.mxu1 %v1398_v2  ;;  %p1458_p4 = pnand %p1457_p3, %p1451_p0 }
 0x233   :  { %520 = vst.msk [vmem:[%s1827_s6 + $0x30] sm:$0xff] %vm425_vm2, %v511_v58  ;;  %v528_v31 = vpack.c.bf16 %v511_v58, %v511_v58 }
 0x235   :  { %1352 = vmatmul.mubr.msk.bf16.vlgmr.msra.gmra.mrb[28].mxu0 %vm425_vm2, %v528_v31 }
 0x236   :  { %1374 = vmatpush3.bf16.msra.mxu0 %v1399_v59 }
 0x237   :  { %1375 = vmatprep.subr.bf16.mxu0 %v1401_v63 }
 0x238   :  { %1358 = vmatmul.mubr.msk.bf16.vlgmr.msra.gmra.mrb[28].mxu1 %vm425_vm2, %v529_v32 }
 0x239   :  { %1362 = vmatpush3.bf16.msra.mxu1 %v1398_v2  ;;  %1365 = vmatprep.mubr.msk.bf16.mxu1 %vm56_vm0, %v1213_v0 }
 0x23a   :  { %1363 = vmatprep.subr.bf16.mxu1 %v1400_v60  ;;  %1376 = vmatpush3.bf16.msra.mxu0 %v1401_v63 }
 0x23d   :  { %1364 = vmatpush3.bf16.msra.mxu1 %v1400_v60 }
 0x240   :  { %1366 = vmatmul.mubr.msk.bf16.vlgmr.msra.gmra.mrb[32].mxu1 %vm56_vm0, %v1214_v62 }
 0x241   :  { %1369 = vmatprep.mubr.msk.bf16.mxu1 %vm56_vm0, %v1215_v61 }
 0x248   :  { %1370 = vmatmul.mubr.msk.bf16.gmra.mrb[36].mxu1 %vm56_vm0, %v1216_v1 }
 0x2ef   :  { %v570_v5 = vpop.f32.mrb[16].mxu0 }
 0x2f0   :  { %v1317_v6 = vpop.f32.mrb[17].mxu0 }
 0x2f1   :  { %v573_v9 = vpop.f32.mrb[18].mxu0 }
 0x2f2   :  { %v1318_v10 = vpop.f32.mrb[19].mxu0 }
 0x2f3   :  { %v615_v7 = vpop.f32.mrb[16].mxu1 }
 0x2f4   :  { %v1217_v19 = vpack.c.bf16 %v615_v7, %v570_v5  ;;  %v1323_v20 = vpop.f32.mrb[17].mxu1 }
 0x2f5   :  { %v618_v8 = vpop.f32.mrb[18].mxu1 }
 0x2f6   :  { %v1324_v13 = vpop.f32.mrb[19].mxu1  ;;  %1377 = vmatprep.mubr.msk.bf16.mxu0 %vm56_vm0, %v1217_v19 }
 0x2f7   :  { %v660_v14 = vpop.f32.mrb[20].mxu0 }
 0x2f8   :  { %v1329_v29 = vpop.f32.mrb[21].mxu0 }
 0x2f9   :  { %v663_v30 = vpop.f32.mrb[22].mxu0 }
 0x2fa   :  { %v1330_v15 = vpop.f32.mrb[23].mxu0 }
 0x2fb   :  { %v705_v37 = vpop.f32.mrb[20].mxu1 }
 0x2fc   :  { %v1218_v38 = vpack.c.bf16 %v705_v37, %v660_v14  ;;  %v1335_v16 = vpop.f32.mrb[21].mxu1 }
 0x2fd   :  { %v708_v17 = vpop.f32.mrb[22].mxu1 }
 0x2fe   :  { %v1336_v18 = vpop.f32.mrb[23].mxu1  ;;  %1378 = vmatmul.mubr.msk.bf16.vlgmr.msra.gmra.mrb[32].mxu0 %vm56_vm0, %v1218_v38 }
 0x300   :  { %v750_v23 = vpop.f32.mrb[24].mxu0 }
 0x301   :  { %v1341_v24 = vpop.f32.mrb[25].mxu0 }
 0x302   :  { %v753_v25 = vpop.f32.mrb[26].mxu0 }
 0x303   :  { %v1342_v26 = vpop.f32.mrb[27].mxu0  ;;  %v795_v27 = vpop.f32.mrb[24].mxu1 }
 0x304   :  { %v1219_v28 = vpack.c.bf16 %v795_v27, %v750_v23  ;;  %v1347_v3 = vpop.f32.mrb[25].mxu1 }
 0x305   :  { %v798_v4 = vpop.f32.mrb[26].mxu1 }
 0x306   :  { %v1348_v33 = vpop.f32.mrb[27].mxu1  ;;  %1381 = vmatprep.mubr.msk.bf16.mxu0 %vm56_vm0, %v1219_v28 }
 0x308   :  { %v840_v34 = vpop.f32.mrb[28].mxu0 }
 0x309   :  { %v1353_v35 = vpop.f32.mrb[29].mxu0 }
 0x30a   :  { %v843_v36 = vpop.f32.mrb[30].mxu0 }
 0x30b   :  { %v1354_v39 = vpop.f32.mrb[31].mxu0  ;;  %v885_v11 = vpop.f32.mrb[28].mxu1 }
 0x30c   :  { %v1220_v40 = vpack.c.bf16 %v885_v11, %v840_v34  ;;  %v1359_v43 = vpop.f32.mrb[29].mxu1 }
 0x30d   :  { %v888_v44 = vpop.f32.mrb[30].mxu1 }
 0x30e   :  { %v1360_v12 = vpop.f32.mrb[31].mxu1  ;;  %1382 = vmatmul.mubr.msk.bf16.gmra.mrb[36].mxu0 %vm56_vm0, %v1220_v40 }
 0x313   :  { %v1367_v45 = vpop.f32.mrb[32].mxu1 }
 0x314   :  { %v985_v46 = vpop.f32.mrb[33].mxu1 }
 0x315   :  { %v1368_v47 = vpop.f32.mrb[34].mxu1 }
 0x316   :  { %v988_v48 = vpop.f32.mrb[35].mxu1 }
 0x31b   :  { %v1371_v49 = vpop.f32.mrb[36].mxu1 }
 0x31c   :  { %v1001_v21 = vpop.f32.mrb[37].mxu1 }
 0x31d   :  { %v1372_v50 = vpop.f32.mrb[38].mxu1 }
 0x31e   :  { %v1004_v53 = vpop.f32.mrb[39].mxu1 }
 0x3d1   :  { %v1379_v41 = vpop.f32.mrb[32].mxu0 }
 0x3d2   :  { %v1103_v22 = vadd.f32 %v1379_v41, %v1367_v45  ;;  %v1094_v55 = vpop.f32.mrb[33].mxu0 }
 0x3d3   :  { %v1095_v42 = vadd.f32 %v1094_v55, %v985_v46  ;;  %v1380_v56 = vpop.f32.mrb[34].mxu0 }
 0x3d4   :  { %v1134_v57 = vadd.f32 %v1212_v54, %v1103_v22  ;;  %v1106_v51 = vadd.f32 %v1380_v56, %v1368_v47  ;;  %v1097_v52 = vpop.f32.mrb[35].mxu0 }
 0x3d5   :  { %v1132_v58 = vadd.f32 %v1212_v54, %v1095_v42  ;;  %v1098_v31 = vadd.f32 %v1097_v52, %v988_v48 }
 0x3d6   :  { %1434 = vtanh.f32 %v1134_v57  ;;  %v1135_v32 = vadd.f32 %v1212_v54, %v1106_v51 }
 0x3d7   :  { %1436 = vtanh.f32 %v1132_v58  ;;  %v1133_v2 = vadd.f32 %v1212_v54, %v1098_v31 }
 0x3d8   :  { %1438 = vtanh.f32 %v1135_v32 }
 0x3d9   :  { %1440 = vtanh.f32 %v1133_v2 }
 0x3e0   :  { %v1435_v59 = vpop.eup %1434 }
 0x3e1   :  { %v1437_v60 = vpop.eup %1436  ;;  %1150 = vst.msk [vmem:[#allocation2 + $0x10] sm:$0xff] %vm56_vm0, %v1435_v59  ;;  %v1383_v63 = vpop.f32.mrb[36].mxu0 }
 0x3e2   :  { %v1439_v0 = vpop.eup %1438  ;;  %1148 = vst.msk [vmem:[#allocation2] sm:$0xff] %vm56_vm0, %v1437_v60  ;;  %v1119_v62 = vadd.f32 %v1383_v63, %v1371_v49  ;;  %v1110_v61 = vpop.f32.mrb[37].mxu0 }
 0x3e3   :  { %v1441_v1 = vpop.eup %1440  ;;  %1151 = vst.msk [vmem:[#allocation2 + $0x18] sm:$0xff] %vm56_vm0, %v1439_v0  ;;  %v1111_v5 = vadd.f32 %v1110_v61, %v1001_v21  ;;  %v1384_v6 = vpop.f32.mrb[38].mxu0 }
 0x3e4   :  { %1149 = vst.msk [vmem:[#allocation2 + $0x8] sm:$0xff] %vm56_vm0, %v1441_v1  ;;  %v1138_v9 = vadd.f32 %v1212_v54, %v1119_v62  ;;  %v1122_v10 = vadd.f32 %v1384_v6, %v1372_v50  ;;  %v1113_v7 = vpop.f32.mrb[39].mxu0 }
 0x3e5   :  { %v1136_v19 = vadd.f32 %v1212_v54, %v1111_v5  ;;  %v1114_v20 = vadd.f32 %v1113_v7, %v1004_v53 }
 0x3e6   :  { %1442 = vtanh.f32 %v1138_v9  ;;  %v1139_v8 = vadd.f32 %v1212_v54, %v1122_v10 }
 0x3e7   :  { %1444 = vtanh.f32 %v1136_v19  ;;  %v1137_v13 = vadd.f32 %v1212_v54, %v1114_v20 }
 0x3e8   :  { %1446 = vtanh.f32 %v1139_v8 }
 0x3e9   :  { %1448 = vtanh.f32 %v1137_v13 }
 0x3f0   :  { %v1443_v14 = vpop.eup %1442 }
 0x3f1   :  { %v1445_v29 = vpop.eup %1444  ;;  %1154 = vst.msk [vmem:[#allocation2 + $0x30] sm:$0xff] %vm56_vm0, %v1443_v14 }
 0x3f2   :  { %v1447_v30 = vpop.eup %1446  ;;  %1152 = vst.msk [vmem:[#allocation2 + $0x20] sm:$0xff] %vm56_vm0, %v1445_v29 }
 0x3f3   :  { %v1449_v15 = vpop.eup %1448  ;;  %1155 = vst.msk [vmem:[#allocation2 + $0x38] sm:$0xff] %vm56_vm0, %v1447_v30 }
 0x3f4   :  { %1153 = vst.msk [vmem:[#allocation2 + $0x28] sm:$0xff] %vm56_vm0, %v1449_v15 }
 0x3f5   :  { %1461 = shalt.err (!%p1458_p4)
}
 0x3f6   :  { %s1462_s28 = scalar_lea.hbm %s1826_s5, 1024 }
 0x3f7   :  { %p1463_p5 = scmp.ne.s32.totalorder %s1826_s5, %s1462_s28  ;;  %p1466_p6 = scmp.lt.u32.totalorder %s1462_s28, %s1826_s5 }
 0x3f9   :  { %p1468_p7 = pnand %p1466_p6, %p1463_p5 }
 0x3fb   :  { %1471 = shalt.err (!%p1468_p7)
}
 0x3fc   :  { %s1477_s9 = smov 128   ;;  %s1478_s10 = smov 8  }
 0x3fd   :  { %1167 = dma.vmem_to_hbm [thread:$0]  %s1162_s25, 1024, %s1826_s5, [#allocation3], %s1477_s9, %s1477_s9, %s1478_s10  }
 0x3fe   :  { %1472 = dma.done.wait [#allocation3], 1024  }
 0x3ff   :  { %1473 = vsyncadd [#allocation3], 4294966272 }
 0x400   :  { %1175 = vsyncpa [#allocation3], 1 }

// kernel: tpu_custom_call.1
= control target key start
LH: loop header
LB: loop body
LE: loop exit
PB: predicated region body
PF: predicated region fallthrough
CT: control target
= control target key end

     0   :  { %vm56_vm0 = vcmask 261120   ;;  %v1474_v2 = vmov 0.0   ;;  %vm1475_vm1 = vmmov 0   ;;  %s1821_s0 = inlined_call_operand.vmem [shape: f32[8,8,32], index: 0, kind: input, shape index: {}]   ;;  %s1822_s1 = inlined_call_operand.vmem [shape: f32[8,6,32], index: 1, kind: input, shape index: {}]   ;;  %s1823_s2 = inlined_call_operand.vmem [shape: bf16[32,32], index: 2, kind: input, shape index: {}]   ;;  %s1824_s3 = inlined_call_operand.vmem [shape: bf16[32,32], index: 3, kind: input, shape index: {}]   ;;  %s1825_s4 = inlined_call_operand.vmem [shape: f32[1,32], index: 4, kind: input, shape index: {}]   ;;  %s1826_s5 = inlined_call_operand.hbm [shape: f32[8,8,32], index: 5, kind: output, shape index: {0}]   ;;  %s1827_s6 = inlined_call_operand.vmem [shape: f32[8,8,6], index: 6, kind: output, shape index: {1}]  }
   0x1   :  { %v40_v0 = vld [vmem:[%s1822_s1] sm:$0x3f]  ;;  %v41_v1 = vld [vmem:[%s1822_s1 + $0x8] sm:$0x3f]  ;;  %1265 = vmatprep.subr.bf16.mxu0 %v1474_v2  ;;  %1271 = vmatprep.subr.bf16.mxu1 %v1474_v2  ;;  %v42_v5 = vld [vmem:[%s1822_s1 + $0x10] sm:$0x3f] }
   0x2   :  { %v1522_v3 = vpack.c.bf16 %v40_v0, %v40_v0  ;;  %v1524_v4 = vpack.c.bf16 %v41_v1, %v41_v1  ;;  %1267 = vmatprep.mubr.msk.bf16.mxu0 %vm1475_vm1, %v1474_v2  ;;  %1273 = vmatprep.mubr.msk.bf16.mxu1 %vm1475_vm1, %v1474_v2  ;;  %v43_v6 = vld [vmem:[%s1822_s1 + $0x18] sm:$0x3f]  ;;  %v1543_v9 = vld [vmem:[%s1821_s0] sm:$0xff]  ;;  %v1548_v10 = vld [vmem:[%s1821_s0 + $0x8] sm:$0xff]  ;;  %v1550_v11 = vpack.c.bf16 %v42_v5, %v42_v5 }
   0x3   :  { %v1552_v12 = vpack.c.bf16 %v43_v6, %v43_v6  ;;  %v32_v13 = vpack.c.bf16 %v1543_v9, %v1543_v9  ;;  %v33_v14 = vpack.c.bf16 %v1548_v10, %v1548_v10 }
   0x4   :  { %v61_v7 = vsel %vm56_vm0, %v1522_v3, 0  ;;  %v107_v8 = vsel %vm56_vm0, %v1524_v4, 0  ;;  %v153_v15 = vsel %vm56_vm0, %v1550_v11, 0 }
   0x5   :  { %1266 = vmatpush3.bf16.xpose.msra.mxu0 %v61_v7  ;;  %1272 = vmatpush3.bf16.xpose.msra.mxu1 %v107_v8  ;;  %v199_v16 = vsel %vm56_vm0, %v1552_v12, 0 }
   0x6   :  { %1277 = vmatprep.subr.bf16.mxu0 %v1474_v2  ;;  %1283 = vmatprep.subr.bf16.mxu1 %v1474_v2 }
   0x7   :  { %12 = vsyncpa [#allocation3], 0  ;;  %v44_v17 = vld [vmem:[%s1822_s1 + $0x20] sm:$0x3f]  ;;  %v45_v18 = vld [vmem:[%s1822_s1 + $0x28] sm:$0x3f] }
   0x8   :  { %v1575_v19 = vld [vmem:[%s1821_s0 + $0x10] sm:$0xff]  ;;  %v1580_v20 = vld [vmem:[%s1821_s0 + $0x18] sm:$0xff]  ;;  %v1586_v21 = vpack.c.bf16 %v44_v17, %v44_v17  ;;  %v1588_v22 = vpack.c.bf16 %v45_v18, %v45_v18  ;;  %v1611_v29 = vld [vmem:[%s1821_s0 + $0x20] sm:$0xff]  ;;  %vm425_vm2 = vcmask 48128   ;;  %vm533_vm3 = vcmask 1042432  }
   0x9   :  { %v34_v23 = vpack.c.bf16 %v1575_v19, %v1575_v19  ;;  %v35_v24 = vpack.c.bf16 %v1580_v20, %v1580_v20  ;;  %v46_v27 = vld [vmem:[%s1822_s1 + $0x30] sm:$0x3f]  ;;  %v47_v28 = vld [vmem:[%s1822_s1 + $0x38] sm:$0x3f]  ;;  %v1616_v30 = vld [vmem:[%s1821_s0 + $0x28] sm:$0xff]  ;;  %v36_v33 = vpack.c.bf16 %v1611_v29, %v1611_v29 }
   0xa   :  { %v245_v25 = vsel %vm56_vm0, %v1586_v21, 0  ;;  %v291_v26 = vsel %vm56_vm0, %v1588_v22, 0  ;;  %v1622_v31 = vpack.c.bf16 %v46_v27, %v46_v27  ;;  %v1624_v32 = vpack.c.bf16 %v47_v28, %v47_v28  ;;  %v1641_v37 = vld [vmem:[%s1821_s0 + $0x30] sm:$0xff]  ;;  %v1646_v38 = vld [vmem:[%s1821_s0 + $0x38] sm:$0xff] }
   0xb   :  { %v37_v34 = vpack.c.bf16 %v1616_v30, %v1616_v30  ;;  %v38_v39 = vpack.c.bf16 %v1641_v37, %v1641_v37  ;;  %v39_v40 = vpack.c.bf16 %v1646_v38, %v1646_v38 }
   0xc   :  { %1268 = vmatmul.mubr.msk.bf16.vlgmr.msra.gmra.mrb[0].mxu0 %vm56_vm0, %v32_v13  ;;  %1274 = vmatmul.mubr.msk.bf16.vlgmr.msra.gmra.mrb[0].mxu1 %vm56_vm0, %v33_v14  ;;  %v337_v35 = vsel %vm56_vm0, %v1622_v31, 0  ;;  %v383_v36 = vsel %vm56_vm0, %v1624_v32, 0 }
   0xd   :  { %1278 = vmatpush3.bf16.xpose.msra.mxu0 %v153_v15  ;;  %1284 = vmatpush3.bf16.xpose.msra.mxu1 %v199_v16 }
   0xe   :  { %1279 = vmatprep.mubr.msk.bf16.mxu0 %vm1475_vm1, %v1474_v2  ;;  %1285 = vmatprep.mubr.msk.bf16.mxu1 %vm1475_vm1, %v1474_v2 }
   0xf   :  { %1289 = vmatprep.subr.bf16.mxu0 %v1474_v2  ;;  %1295 = vmatprep.subr.bf16.mxu1 %v1474_v2 }
  0x14   :  { %1280 = vmatmul.mubr.msk.bf16.vlgmr.msra.gmra.mrb[4].mxu0 %vm56_vm0, %v34_v23  ;;  %1286 = vmatmul.mubr.msk.bf16.vlgmr.msra.gmra.mrb[4].mxu1 %vm56_vm0, %v35_v24 }
  0x15   :  { %1290 = vmatpush3.bf16.xpose.msra.mxu0 %v245_v25  ;;  %1296 = vmatpush3.bf16.xpose.msra.mxu1 %v291_v26 }
  0x16   :  { %1291 = vmatprep.mubr.msk.bf16.mxu0 %vm1475_vm1, %v1474_v2  ;;  %1297 = vmatprep.mubr.msk.bf16.mxu1 %vm1475_vm1, %v1474_v2 }
  0x17   :  { %1301 = vmatprep.subr.bf16.mxu0 %v1474_v2  ;;  %1307 = vmatprep.subr.bf16.mxu1 %v1474_v2 }
  0x1c   :  { %1292 = vmatmul.mubr.msk.bf16.vlgmr.msra.gmra.mrb[8].mxu0 %vm56_vm0, %v36_v33  ;;  %1298 = vmatmul.mubr.msk.bf16.vlgmr.msra.gmra.mrb[8].mxu1 %vm56_vm0, %v37_v34 }
  0x1d   :  { %1302 = vmatpush3.bf16.xpose.msra.mxu0 %v337_v35  ;;  %1308 = vmatpush3.bf16.xpose.msra.mxu1 %v383_v36 }
  0x1e   :  { %1303 = vmatprep.mubr.msk.bf16.mxu0 %vm1475_vm1, %v1474_v2  ;;  %1309 = vmatprep.mubr.msk.bf16.mxu1 %vm1475_vm1, %v1474_v2 }
  0x1f   :  { %1313 = vmatprep.subr.bf16.mxu0 %v1474_v2  ;;  %1319 = vmatprep.subr.bf16.mxu1 %v1474_v2 }
  0x24   :  { %1304 = vmatmul.mubr.msk.bf16.vlgmr.msra.gmra.mrb[12].mxu0 %vm56_vm0, %v38_v39  ;;  %1310 = vmatmul.mubr.msk.bf16.vlgmr.msra.gmra.mrb[12].mxu1 %vm56_vm0, %v39_v40 }
  0x25   :  { %1315 = vmatprep.mubr.msk.bf16.mxu0 %vm1475_vm1, %v1474_v2  ;;  %1321 = vmatprep.mubr.msk.bf16.mxu1 %vm1475_vm1, %v1474_v2 }
  0xdf   :  { %v97_v41 = vpop.f32.mrb[0].mxu0  ;;  %v143_v42 = vpop.f32.mrb[0].mxu1 }
  0xe0   :  { %v1269_v43 = vpop.f32.mrb[1].mxu0  ;;  %v426_v44 = vsel %vm425_vm2, %v97_v41, -inf  ;;  %v1275_v45 = vpop.f32.mrb[1].mxu1  ;;  %v429_v50 = vsel %vm425_vm2, %v143_v42, -inf }
  0xe1   :  { %427 = vmax.xlane.f32.xlu0 %v426_v44  ;;  %v100_v46 = vpop.f32.mrb[2].mxu0  ;;  %v146_v47 = vpop.f32.mrb[2].mxu1 }
  0xe2   :  { %v1270_v48 = vpop.f32.mrb[3].mxu0  ;;  %v1276_v49 = vpop.f32.mrb[3].mxu1 }
  0xe5   :  { %430 = vmax.xlane.f32.xlu0 %v429_v50 }
  0xe7   :  { %v189_v51 = vpop.f32.mrb[4].mxu0  ;;  %v235_v52 = vpop.f32.mrb[4].mxu1 }
  0xe8   :  { %v1281_v53 = vpop.f32.mrb[5].mxu0  ;;  %v432_v54 = vsel %vm425_vm2, %v189_v51, -inf  ;;  %v1287_v55 = vpop.f32.mrb[5].mxu1  ;;  %v435_v60 = vsel %vm425_vm2, %v235_v52, -inf }
  0xe9   :  { %433 = vmax.xlane.f32.xlu1 %v432_v54  ;;  %v192_v56 = vpop.f32.mrb[6].mxu0  ;;  %v238_v57 = vpop.f32.mrb[6].mxu1 }
  0xea   :  { %v1282_v58 = vpop.f32.mrb[7].mxu0  ;;  %v1288_v59 = vpop.f32.mrb[7].mxu1 }
  0xed   :  { %436 = vmax.xlane.f32.xlu1 %v435_v60 }
  0xef   :  { %v281_v61 = vpop.f32.mrb[8].mxu0  ;;  %v327_v62 = vpop.f32.mrb[8].mxu1 }
  0xf0   :  { %v441_v63 = vsel %vm425_vm2, %v327_v62, -inf  ;;  %v438_v0 = vsel %vm425_vm2, %v281_v61, -inf  ;;  %v1293_v1 = vpop.f32.mrb[9].mxu0  ;;  %v1299_v5 = vpop.f32.mrb[9].mxu1 }
  0xf1   :  { %442 = vmax.xlane.f32.xlu1 %v441_v63  ;;  %439 = vmax.xlane.f32.xlu0 %v438_v0  ;;  %v284_v6 = vpop.f32.mrb[10].mxu0  ;;  %v330_v7 = vpop.f32.mrb[10].mxu1 }
  0xf2   :  { %v1294_v8 = vpop.f32.mrb[11].mxu0  ;;  %v1300_v13 = vpop.f32.mrb[11].mxu1 }
  0xf7   :  { %v373_v14 = vpop.f32.mrb[12].mxu0  ;;  %v419_v15 = vpop.f32.mrb[12].mxu1 }
  0xf8   :  { %v447_v16 = vsel %vm425_vm2, %v419_v15, -inf  ;;  %v444_v17 = vsel %vm425_vm2, %v373_v14, -inf  ;;  %v1305_v18 = vpop.f32.mrb[13].mxu0  ;;  %v1311_v23 = vpop.f32.mrb[13].mxu1 }
  0xf9   :  { %448 = vmax.xlane.f32.xlu1 %v447_v16  ;;  %445 = vmax.xlane.f32.xlu0 %v444_v17  ;;  %v376_v24 = vpop.f32.mrb[14].mxu0  ;;  %v422_v25 = vpop.f32.mrb[14].mxu1  ;;  %v534_v17 = vsel %vm533_vm3, %v1522_v3, 0  ;;  %v579_v18 = vsel %vm533_vm3, %v1524_v4, 0  ;;  %v624_v4 = vsel %vm533_vm3, %v1550_v11, 0  ;;  %v669_v11 = vsel %vm533_vm3, %v1552_v12, 0 }
  0xfa   :  { %v1306_v26 = vpop.f32.mrb[15].mxu0  ;;  %v1312_v27 = vpop.f32.mrb[15].mxu1  ;;  %1314 = vmatpush3.bf16.msra.mxu0 %v534_v17  ;;  %1320 = vmatpush3.bf16.msra.mxu1 %v579_v18  ;;  %v714_v12 = vsel %vm533_vm3, %v1586_v21, 0  ;;  %v759_v21 = vsel %vm533_vm3, %v1588_v22, 0 }
  0xfb   :  { %1325 = vmatprep.subr.bf16.mxu0 %v1474_v2  ;;  %1331 = vmatprep.subr.bf16.mxu1 %v1474_v2 }
 0x16e   :  { %v428_v28 = vpop.xlane.xlu0 %427 }
 0x16f   :  { %v450_v33 = vsub.f32 %v97_v41, %v428_v28 }
 0x171   :  { %v458_v34 = vmul.f32 1.442695, %v450_v33 }
 0x172   :  { %v431_v35 = vpop.xlane.xlu0 %430 }
 0x173   :  { %1402 = vpow2.f32 %v458_v34  ;;  %v451_v36 = vsub.f32 %v143_v42, %v431_v35 }
 0x175   :  { %v460_v39 = vmul.f32 1.442695, %v451_v36 }
 0x176   :  { %v434_v40 = vpop.xlane.xlu1 %433 }
 0x177   :  { %1404 = vpow2.f32 %v460_v39  ;;  %v452_v43 = vsub.f32 %v189_v51, %v434_v40 }
 0x179   :  { %v462_v44 = vmul.f32 1.442695, %v452_v43 }
 0x17a   :  { %v437_v45 = vpop.xlane.xlu1 %436 }
 0x17b   :  { %1406 = vpow2.f32 %v462_v44  ;;  %v453_v46 = vsub.f32 %v235_v52, %v437_v45 }
 0x17d   :  { %v1403_v47 = vpop.eup %1402  ;;  %v464_v48 = vmul.f32 1.442695, %v453_v46 }
 0x17e   :  { %v443_v49 = vpop.xlane.xlu1 %442  ;;  %v440_v50 = vpop.xlane.xlu0 %439  ;;  %v474_v53 = vsel %vm425_vm2, %v1403_v47, 0.0 }
 0x17f   :  { %1408 = vpow2.f32 %v464_v48  ;;  %v455_v41 = vsub.f32 %v327_v62, %v443_v49  ;;  %v454_v54 = vsub.f32 %v281_v61, %v440_v50  ;;  %475 = vadd.xlane.f32.xlu0 %v474_v53 }
 0x181   :  { %v1405_v55 = vpop.eup %1404  ;;  %v468_v42 = vmul.f32 1.442695, %v455_v41  ;;  %v466_v56 = vmul.f32 1.442695, %v454_v54 }
 0x182   :  { %v477_v57 = vsel %vm425_vm2, %v1405_v55, 0.0 }
 0x183   :  { %1410 = vpow2.f32 %v468_v42  ;;  %478 = vadd.xlane.f32.xlu1 %v477_v57 }
 0x184   :  { %1412 = vpow2.f32 %v466_v56  ;;  %v849_v56 = vsel %vm533_vm3, %v1624_v32, 0 }
 0x185   :  { %v1407_v51 = vpop.eup %1406 }
 0x186   :  { %v449_v52 = vpop.xlane.xlu1 %448  ;;  %v446_v58 = vpop.xlane.xlu0 %445  ;;  %v480_v59 = vsel %vm425_vm2, %v1407_v51, 0.0 }
 0x187   :  { %v457_v60 = vsub.f32 %v419_v15, %v449_v52  ;;  %v456_v63 = vsub.f32 %v373_v14, %v446_v58  ;;  %481 = vadd.xlane.f32.xlu0 %v480_v59  ;;  %v1399_v59 = vld [vmem:[%s1823_s2] sm:$0xff]  }
 0x189   :  { %v1409_v0 = vpop.eup %1408  ;;  %v472_v62 = vmul.f32 1.442695, %v457_v60  ;;  %v470_v61 = vmul.f32 1.442695, %v456_v63  ;;  %v1400_v60 = vld [vmem:[%s1824_s3 + $0x8] sm:$0xff]  }
 0x18a   :  { %v483_v1 = vsel %vm425_vm2, %v1409_v0, 0.0  ;;  %v1401_v63 = vld [vmem:[%s1823_s2 + $0x8] sm:$0xff]  }
 0x18b   :  { %1414 = vpow2.f32 %v472_v62  ;;  %484 = vadd.xlane.f32.xlu1 %v483_v1  ;;  %v1214_v62 = vpack.c.bf16 %v1580_v20, %v1575_v19  ;;  %v1216_v1 = vpack.c.bf16 %v1646_v38, %v1641_v37 }
 0x18c   :  { %1416 = vpow2.f32 %v470_v61  ;;  %v1215_v61 = vpack.c.bf16 %v1616_v30, %v1611_v29 }
 0x18d   :  { %v1676_v5 = vpop.eup %1410 }
 0x18e   :  { %v1678_v6 = vpop.eup %1412  ;;  %v489_v7 = vsel %vm425_vm2, %v1676_v5, 0.0 }
 0x18f   :  { %490 = vadd.xlane.f32.xlu1 %v489_v7  ;;  %v486_v8 = vsel %vm425_vm2, %v1678_v6, 0.0 }
 0x190   :  { %487 = vadd.xlane.f32.xlu0 %v486_v8 }
 0x195   :  { %v1684_v13 = vpop.eup %1414 }
 0x196   :  { %v1686_v14 = vpop.eup %1416  ;;  %v495_v15 = vsel %vm425_vm2, %v1684_v13, 0.0 }
 0x197   :  { %496 = vadd.xlane.f32.xlu1 %v495_v15  ;;  %v492_v16 = vsel %vm425_vm2, %v1686_v14, 0.0 }
 0x198   :  { %493 = vadd.xlane.f32.xlu0 %v492_v16 }
 0x20c   :  { %v476_v23 = vpop.xlane.xlu0 %475 }
 0x20d   :  { %1418 = vrcp.f32 %v476_v23 }
 0x210   :  { %v479_v24 = vpop.xlane.xlu1 %478 }
 0x211   :  { %1420 = vrcp.f32 %v479_v24 }
 0x214   :  { %v482_v25 = vpop.xlane.xlu0 %481 }
 0x215   :  { %1422 = vrcp.f32 %v482_v25 }
 0x217   :  { %v1419_v26 = vpop.eup %1418 }
 0x218   :  { %v499_v27 = vmul.f32 %v1419_v26, %v1403_v47  ;;  %v485_v28 = vpop.xlane.xlu1 %484 }
 0x219   :  { %1424 = vrcp.f32 %v485_v28 }
 0x21a   :  { %514 = vst.msk [vmem:[%s1827_s6] sm:$0xff] %vm425_vm2, %v499_v27  ;;  %v522_v3 = vpack.c.bf16 %v499_v27, %v499_v27 }
 0x21b   :  { %v1421_v33 = vpop.eup %1420 }
 0x21c   :  { %v501_v34 = vmul.f32 %v1421_v33, %v1405_v55  ;;  %v491_v35 = vpop.xlane.xlu1 %490  ;;  %1316 = vmatmul.mubr.msk.bf16.vlgmr.msra.gmra.mrb[16].mxu0 %vm425_vm2, %v522_v3  ;;  %v804_v55 = vsel %vm533_vm3, %v1622_v31, 0 }
 0x21d   :  { %1426 = vrcp.f32 %v491_v35  ;;  %v488_v36 = vpop.xlane.xlu0 %487  ;;  %1326 = vmatpush3.bf16.msra.mxu0 %v624_v4  ;;  %1327 = vmatprep.mubr.msk.bf16.mxu0 %vm1475_vm1, %v1474_v2 }
 0x21e   :  { %515 = vst.msk [vmem:[%s1827_s6 + $0x8] sm:$0xff] %vm425_vm2, %v501_v34  ;;  %1428 = vrcp.f32 %v488_v36  ;;  %v523_v39 = vpack.c.bf16 %v501_v34, %v501_v34  ;;  %1337 = vmatprep.subr.bf16.mxu0 %v1474_v2 }
 0x21f   :  { %v1423_v40 = vpop.eup %1422 }
 0x220   :  { %v503_v43 = vmul.f32 %v1423_v40, %v1407_v51  ;;  %1322 = vmatmul.mubr.msk.bf16.vlgmr.msra.gmra.mrb[16].mxu1 %vm425_vm2, %v523_v39 }
 0x221   :  { %1332 = vmatpush3.bf16.msra.mxu1 %v669_v11  ;;  %1333 = vmatprep.mubr.msk.bf16.mxu1 %vm1475_vm1, %v1474_v2 }
 0x222   :  { %516 = vst.msk [vmem:[%s1827_s6 + $0x10] sm:$0xff] %vm425_vm2, %v503_v43  ;;  %v524_v44 = vpack.c.bf16 %v503_v43, %v503_v43  ;;  %1343 = vmatprep.subr.bf16.mxu1 %v1474_v2 }
 0x223   :  { %v1425_v45 = vpop.eup %1424 }
 0x224   :  { %v505_v46 = vmul.f32 %v1425_v45, %v1409_v0  ;;  %v497_v47 = vpop.xlane.xlu1 %496  ;;  %1328 = vmatmul.mubr.msk.bf16.vlgmr.msra.gmra.mrb[20].mxu0 %vm425_vm2, %v524_v44  ;;  %v1213_v0 = vpack.c.bf16 %v1548_v10, %v1543_v9 }
 0x225   :  { %1430 = vrcp.f32 %v497_v47  ;;  %v494_v48 = vpop.xlane.xlu0 %493  ;;  %1338 = vmatpush3.bf16.msra.mxu0 %v714_v12  ;;  %1339 = vmatprep.mubr.msk.bf16.mxu0 %vm1475_vm1, %v1474_v2 }
 0x226   :  { %517 = vst.msk [vmem:[%s1827_s6 + $0x18] sm:$0xff] %vm425_vm2, %v505_v46  ;;  %1432 = vrcp.f32 %v494_v48  ;;  %v525_v49 = vpack.c.bf16 %v505_v46, %v505_v46  ;;  %1349 = vmatprep.subr.bf16.mxu0 %v1474_v2 }
 0x227   :  { %v1427_v50 = vpop.eup %1426 }
 0x228   :  { %v1429_v53 = vpop.eup %1428  ;;  %v509_v41 = vmul.f32 %v1427_v50, %v1676_v5  ;;  %1334 = vmatmul.mubr.msk.bf16.vlgmr.msra.gmra.mrb[20].mxu1 %vm425_vm2, %v525_v49 }
 0x229   :  { %v507_v54 = vmul.f32 %v1429_v53, %v1678_v6  ;;  %1344 = vmatpush3.bf16.msra.mxu1 %v759_v21  ;;  %1345 = vmatprep.mubr.msk.bf16.mxu1 %vm1475_vm1, %v1474_v2 }
 0x22a   :  { %519 = vst.msk [vmem:[%s1827_s6 + $0x28] sm:$0xff] %vm425_vm2, %v509_v41  ;;  %1355 = vmatprep.subr.bf16.mxu1 %v1474_v2  ;;  %v527_v42 = vpack.c.bf16 %v509_v41, %v509_v41 }
 0x22b   :  { %518 = vst.msk [vmem:[%s1827_s6 + $0x20] sm:$0xff] %vm425_vm2, %v507_v54  ;;  %v526_v22 = vpack.c.bf16 %v507_v54, %v507_v54  ;;  %v1212_v54 = vld [vmem:[%s1825_s4] ss:$0 sm:$0xff]  ;;  %s1476_s4 = smov [#allocation2]  }
 0x22c   :  { %s1161_s25 = sshll.u32 %s1476_s4, 4  ;;  %s1162_s25 = int_to_ptr.vmem [resolvable:$true] %s1161_s25 }
 0x22d   :  { %1340 = vmatmul.mubr.msk.bf16.vlgmr.msra.gmra.mrb[24].mxu0 %vm425_vm2, %v526_v22  ;;  %s1450_s26 = scalar_lea.vmem %s1162_s25, 1024  ;;  %p1455_p1 = scmp.lt.s32.totalorder %s1162_s25, %s1162_s25 }
 0x22e   :  { %1350 = vmatpush3.bf16.msra.mxu0 %v804_v55  ;;  %1351 = vmatprep.mubr.msk.bf16.mxu0 %vm1475_vm1, %v1474_v2  ;;  %p1451_p0 = scmp.ne.s32.totalorder %s1162_s25, %s1450_s26  ;;  %p1456_p2 = scmp.lt.s32.totalorder %s1450_s26, %s1450_s26 }
 0x22f   :  { %v1431_v57 = vpop.eup %1430  ;;  %1373 = vmatprep.subr.bf16.mxu0 %v1399_v59 }
 0x230   :  { %v1433_v51 = vpop.eup %1432  ;;  %v513_v52 = vmul.f32 %v1431_v57, %v1684_v13  ;;  %1346 = vmatmul.mubr.msk.bf16.vlgmr.msra.gmra.mrb[24].mxu1 %vm425_vm2, %v527_v42  ;;  %p1457_p3 = por %p1456_p2, %p1455_p1 }
 0x231   :  { %v511_v58 = vmul.f32 %v1433_v51, %v1686_v14  ;;  %1356 = vmatpush3.bf16.msra.mxu1 %v849_v56  ;;  %1357 = vmatprep.mubr.msk.bf16.mxu1 %vm1475_vm1, %v1474_v2  ;;  %v1398_v2 = vld [vmem:[%s1824_s3] sm:$0xff]  }
 0x232   :  { %521 = vst.msk [vmem:[%s1827_s6 + $0x38] sm:$0xff] %vm425_vm2, %v513_v52  ;;  %v529_v32 = vpack.c.bf16 %v513_v52, %v513_v52  ;;  %1361 = vmatprep.subr.bf16.mxu1 %v1398_v2  ;;  %p1458_p4 = pnand %p1457_p3, %p1451_p0 }
 0x233   :  { %520 = vst.msk [vmem:[%s1827_s6 + $0x30] sm:$0xff] %vm425_vm2, %v511_v58  ;;  %v528_v31 = vpack.c.bf16 %v511_v58, %v511_v58 }
 0x235   :  { %1352 = vmatmul.mubr.msk.bf16.vlgmr.msra.gmra.mrb[28].mxu0 %vm425_vm2, %v528_v31 }
 0x236   :  { %1374 = vmatpush3.bf16.msra.mxu0 %v1399_v59 }
 0x237   :  { %1375 = vmatprep.subr.bf16.mxu0 %v1401_v63 }
 0x238   :  { %1358 = vmatmul.mubr.msk.bf16.vlgmr.msra.gmra.mrb[28].mxu1 %vm425_vm2, %v529_v32 }
 0x239   :  { %1362 = vmatpush3.bf16.msra.mxu1 %v1398_v2  ;;  %1365 = vmatprep.mubr.msk.bf16.mxu1 %vm56_vm0, %v1213_v0 }
 0x23a   :  { %1363 = vmatprep.subr.bf16.mxu1 %v1400_v60  ;;  %1376 = vmatpush3.bf16.msra.mxu0 %v1401_v63 }
 0x23d   :  { %1364 = vmatpush3.bf16.msra.mxu1 %v1400_v60 }
 0x240   :  { %1366 = vmatmul.mubr.msk.bf16.vlgmr.msra.gmra.mrb[32].mxu1 %vm56_vm0, %v1214_v62 }
 0x241   :  { %1369 = vmatprep.mubr.msk.bf16.mxu1 %vm56_vm0, %v1215_v61 }
 0x248   :  { %1370 = vmatmul.mubr.msk.bf16.gmra.mrb[36].mxu1 %vm56_vm0, %v1216_v1 }
 0x2ef   :  { %v570_v5 = vpop.f32.mrb[16].mxu0 }
 0x2f0   :  { %v1317_v6 = vpop.f32.mrb[17].mxu0 }
 0x2f1   :  { %v573_v9 = vpop.f32.mrb[18].mxu0 }
 0x2f2   :  { %v1318_v10 = vpop.f32.mrb[19].mxu0 }
 0x2f3   :  { %v615_v7 = vpop.f32.mrb[16].mxu1 }
 0x2f4   :  { %v1217_v19 = vpack.c.bf16 %v615_v7, %v570_v5  ;;  %v1323_v20 = vpop.f32.mrb[17].mxu1 }
 0x2f5   :  { %v618_v8 = vpop.f32.mrb[18].mxu1 }
 0x2f6   :  { %v1324_v13 = vpop.f32.mrb[19].mxu1  ;;  %1377 = vmatprep.mubr.msk.bf16.mxu0 %vm56_vm0, %v1217_v19 }
 0x2f7   :  { %v660_v14 = vpop.f32.mrb[20].mxu0 }
 0x2f8   :  { %v1329_v29 = vpop.f32.mrb[21].mxu0 }
 0x2f9   :  { %v663_v30 = vpop.f32.mrb[22].mxu0 }
 0x2fa   :  { %v1330_v15 = vpop.f32.mrb[23].mxu0 }
 0x2fb   :  { %v705_v37 = vpop.f32.mrb[20].mxu1 }
 0x2fc   :  { %v1218_v38 = vpack.c.bf16 %v705_v37, %v660_v14  ;;  %v1335_v16 = vpop.f32.mrb[21].mxu1 }
 0x2fd   :  { %v708_v17 = vpop.f32.mrb[22].mxu1 }
 0x2fe   :  { %v1336_v18 = vpop.f32.mrb[23].mxu1  ;;  %1378 = vmatmul.mubr.msk.bf16.vlgmr.msra.gmra.mrb[32].mxu0 %vm56_vm0, %v1218_v38 }
 0x300   :  { %v750_v23 = vpop.f32.mrb[24].mxu0 }
 0x301   :  { %v1341_v24 = vpop.f32.mrb[25].mxu0 }
 0x302   :  { %v753_v25 = vpop.f32.mrb[26].mxu0 }
 0x303   :  { %v1342_v26 = vpop.f32.mrb[27].mxu0  ;;  %v795_v27 = vpop.f32.mrb[24].mxu1 }
 0x304   :  { %v1219_v28 = vpack.c.bf16 %v795_v27, %v750_v23  ;;  %v1347_v3 = vpop.f32.mrb[25].mxu1 }
 0x305   :  { %v798_v4 = vpop.f32.mrb[26].mxu1 }
 0x306   :  { %v1348_v33 = vpop.f32.mrb[27].mxu1  ;;  %1381 = vmatprep.mubr.msk.bf16.mxu0 %vm56_vm0, %v1219_v28 }
 0x308   :  { %v840_v34 = vpop.f32.mrb[28].mxu0 }
 0x309   :  { %v1353_v35 = vpop.f32.mrb[29].mxu0 }
 0x30a   :  { %v843_v36 = vpop.f32.mrb[30].mxu0 }
 0x30b   :  { %v1354_v39 = vpop.f32.mrb[31].mxu0  ;;  %v885_v11 = vpop.f32.mrb[28].mxu1 }
 0x30c   :  { %v1220_v40 = vpack.c.bf16 %v885_v11, %v840_v34  ;;  %v1359_v43 = vpop.f32.mrb[29].mxu1 }
 0x30d   :  { %v888_v44 = vpop.f32.mrb[30].mxu1 }
 0x30e   :  { %v1360_v12 = vpop.f32.mrb[31].mxu1  ;;  %1382 = vmatmul.mubr.msk.bf16.gmra.mrb[36].mxu0 %vm56_vm0, %v1220_v40 }
 0x313   :  { %v1367_v45 = vpop.f32.mrb[32].mxu1 }
 0x314   :  { %v985_v46 = vpop.f32.mrb[33].mxu1 }
 0x315   :  { %v1368_v47 = vpop.f32.mrb[34].mxu1 }
 0x316   :  { %v988_v48 = vpop.f32.mrb[35].mxu1 }
 0x31b   :  { %v1371_v49 = vpop.f32.mrb[36].mxu1 }
 0x31c   :  { %v1001_v21 = vpop.f32.mrb[37].mxu1 }
 0x31d   :  { %v1372_v50 = vpop.f32.mrb[38].mxu1 }
 0x31e   :  { %v1004_v53 = vpop.f32.mrb[39].mxu1 }
 0x3d1   :  { %v1379_v41 = vpop.f32.mrb[32].mxu0 }
 0x3d2   :  { %v1103_v22 = vadd.f32 %v1379_v41, %v1367_v45  ;;  %v1094_v55 = vpop.f32.mrb[33].mxu0 }
 0x3d3   :  { %v1095_v42 = vadd.f32 %v1094_v55, %v985_v46  ;;  %v1380_v56 = vpop.f32.mrb[34].mxu0 }
 0x3d4   :  { %v1134_v57 = vadd.f32 %v1212_v54, %v1103_v22  ;;  %v1106_v51 = vadd.f32 %v1380_v56, %v1368_v47  ;;  %v1097_v52 = vpop.f32.mrb[35].mxu0 }
 0x3d5   :  { %v1132_v58 = vadd.f32 %v1212_v54, %v1095_v42  ;;  %v1098_v31 = vadd.f32 %v1097_v52, %v988_v48 }
 0x3d6   :  { %1434 = vtanh.f32 %v1134_v57  ;;  %v1135_v32 = vadd.f32 %v1212_v54, %v1106_v51 }
 0x3d7   :  { %1436 = vtanh.f32 %v1132_v58  ;;  %v1133_v2 = vadd.f32 %v1212_v54, %v1098_v31 }
 0x3d8   :  { %1438 = vtanh.f32 %v1135_v32 }
 0x3d9   :  { %1440 = vtanh.f32 %v1133_v2 }
 0x3e0   :  { %v1435_v59 = vpop.eup %1434 }
 0x3e1   :  { %v1437_v60 = vpop.eup %1436  ;;  %1150 = vst.msk [vmem:[#allocation2 + $0x10] sm:$0xff] %vm56_vm0, %v1435_v59  ;;  %v1383_v63 = vpop.f32.mrb[36].mxu0 }
 0x3e2   :  { %v1439_v0 = vpop.eup %1438  ;;  %1148 = vst.msk [vmem:[#allocation2] sm:$0xff] %vm56_vm0, %v1437_v60  ;;  %v1119_v62 = vadd.f32 %v1383_v63, %v1371_v49  ;;  %v1110_v61 = vpop.f32.mrb[37].mxu0 }
 0x3e3   :  { %v1441_v1 = vpop.eup %1440  ;;  %1151 = vst.msk [vmem:[#allocation2 + $0x18] sm:$0xff] %vm56_vm0, %v1439_v0  ;;  %v1111_v5 = vadd.f32 %v1110_v61, %v1001_v21  ;;  %v1384_v6 = vpop.f32.mrb[38].mxu0 }
 0x3e4   :  { %1149 = vst.msk [vmem:[#allocation2 + $0x8] sm:$0xff] %vm56_vm0, %v1441_v1  ;;  %v1138_v9 = vadd.f32 %v1212_v54, %v1119_v62  ;;  %v1122_v10 = vadd.f32 %v1384_v6, %v1372_v50  ;;  %v1113_v7 = vpop.f32.mrb[39].mxu0 }
 0x3e5   :  { %v1136_v19 = vadd.f32 %v1212_v54, %v1111_v5  ;;  %v1114_v20 = vadd.f32 %v1113_v7, %v1004_v53 }
 0x3e6   :  { %1442 = vtanh.f32 %v1138_v9  ;;  %v1139_v8 = vadd.f32 %v1212_v54, %v1122_v10 }
 0x3e7   :  { %1444 = vtanh.f32 %v1136_v19  ;;  %v1137_v13 = vadd.f32 %v1212_v54, %v1114_v20 }
 0x3e8   :  { %1446 = vtanh.f32 %v1139_v8 }
 0x3e9   :  { %1448 = vtanh.f32 %v1137_v13 }
 0x3f0   :  { %v1443_v14 = vpop.eup %1442 }
 0x3f1   :  { %v1445_v29 = vpop.eup %1444  ;;  %1154 = vst.msk [vmem:[#allocation2 + $0x30] sm:$0xff] %vm56_vm0, %v1443_v14 }
 0x3f2   :  { %v1447_v30 = vpop.eup %1446  ;;  %1152 = vst.msk [vmem:[#allocation2 + $0x20] sm:$0xff] %vm56_vm0, %v1445_v29 }
 0x3f3   :  { %v1449_v15 = vpop.eup %1448  ;;  %1155 = vst.msk [vmem:[#allocation2 + $0x38] sm:$0xff] %vm56_vm0, %v1447_v30 }
 0x3f4   :  { %1153 = vst.msk [vmem:[#allocation2 + $0x28] sm:$0xff] %vm56_vm0, %v1449_v15 }
 0x3f5   :  { %1461 = shalt.err (!%p1458_p4)
}
 0x3f6   :  { %s1462_s28 = scalar_lea.hbm %s1826_s5, 1024 }
 0x3f7   :  { %p1463_p5 = scmp.ne.s32.totalorder %s1826_s5, %s1462_s28  ;;  %p1466_p6 = scmp.lt.u32.totalorder %s1462_s28, %s1826_s5 }
 0x3f9   :  { %p1468_p7 = pnand %p1466_p6, %p1463_p5 }
 0x3fb   :  { %1471 = shalt.err (!%p1468_p7)
}
 0x3fc   :  { %s1477_s9 = smov 128   ;;  %s1478_s10 = smov 8  }
 0x3fd   :  { %1167 = dma.vmem_to_hbm [thread:$0]  %s1162_s25, 1024, %s1826_s5, [#allocation3], %s1477_s9, %s1477_s9, %s1478_s10  }
 0x3fe   :  { %1472 = dma.done.wait [#allocation3], 1024  }
 0x3ff   :  { %1473 = vsyncadd [#allocation3], 4294966272 }
 0x400   :  { %1175 = vsyncpa [#allocation3], 1 }

</bundles_post_ra>
